<compile_context>
chip_gen: v5e
topology: v5e:2x2
jax: 0.10.0
libtpu: 0.0.40
codegen_flags: <defaults>
</compile_context>

<pallas_src>
import jax
import jax.numpy as jnp
from jax.experimental import pallas as pl
from jax.experimental.pallas import tpu as pltpu


IN_DIM = 100
IN_PAD = 128            # 100 padded to one full lane tile
H1, H2, H3 = 128, 256, 512
OUT_DIM = 28 * 28       # 784
OUT_PAD = 896           # 7 * 128 (lane-dense output slab)


def _round_up(x, m):
    return (x + m - 1) // m * m


def generator_kernel(x_ref,
                     w1_ref, b1_ref,
                     w2_ref, b2_ref,
                     w3_ref, b3_ref,
                     w4_ref, b4_ref,
                     o_ref):
    # Fused 4-layer MLP on one (TM, 128) batch tile. bf16 operands feed the
    # MXU; accumulation and all elementwise math (bias, ReLU, tanh) stay f32.
    h = jnp.dot(x_ref[...], w1_ref[...], preferred_element_type=jnp.float32)
    h = jnp.maximum(h + b1_ref[...], 0.0)

    h = jnp.dot(h.astype(jnp.bfloat16), w2_ref[...],
                preferred_element_type=jnp.float32)
    h = jnp.maximum(h + b2_ref[...], 0.0)

    h = jnp.dot(h.astype(jnp.bfloat16), w3_ref[...],
                preferred_element_type=jnp.float32)
    h = jnp.maximum(h + b3_ref[...], 0.0)

    h = jnp.dot(h.astype(jnp.bfloat16), w4_ref[...],
                preferred_element_type=jnp.float32)
    o_ref[...] = jnp.tanh(h + b4_ref[...]).astype(o_ref.dtype)


def generator_forward(x, params, tm=256):
    """x: (B, 100) f32. params: list of (W, b) with W (in, out) f32, b (1, out) f32."""
    B = x.shape[0]

    # Batch tile: at most `tm` (256 rows fills the MXU M dim on v6e/v7x),
    # at least the batch rounded up to a sublane multiple of 8.
    tm_eff = min(tm, _round_up(B, 8))
    Bp = _round_up(B, tm_eff)

    (w1, b1), (w2, b2), (w3, b3), (w4, b4) = params

    # Zero-pad to lane-dense shapes and cast weights / activations to bf16.
    x_p = jnp.zeros((Bp, IN_PAD), jnp.bfloat16).at[:B, :IN_DIM].set(
        x.astype(jnp.bfloat16))
    w1_p = jnp.zeros((IN_PAD, H1), jnp.bfloat16).at[:IN_DIM, :].set(
        w1.astype(jnp.bfloat16))
    w2_p = w2.astype(jnp.bfloat16)
    w3_p = w3.astype(jnp.bfloat16)
    w4_p = jnp.zeros((H3, OUT_PAD), jnp.bfloat16).at[:, :OUT_DIM].set(
        w4.astype(jnp.bfloat16))
    b4_p = jnp.zeros((1, OUT_PAD), jnp.float32).at[:, :OUT_DIM].set(b4)

    grid = (Bp // tm_eff,)

    def tile_map(i):      # batch-tiled activations / output
        return (i, 0)

    def resident(i):      # weights/biases: same block every step -> no re-DMA
        return (0, 0)

    in_specs = [
        pl.BlockSpec((tm_eff, IN_PAD), tile_map),
        pl.BlockSpec((IN_PAD, H1), resident),
        pl.BlockSpec((1, H1), resident),
        pl.BlockSpec((H1, H2), resident),
        pl.BlockSpec((1, H2), resident),
        pl.BlockSpec((H2, H3), resident),
        pl.BlockSpec((1, H3), resident),
        pl.BlockSpec((H3, OUT_PAD), resident),
        pl.BlockSpec((1, OUT_PAD), resident),
    ]
    out_spec = pl.BlockSpec((tm_eff, OUT_PAD), tile_map)

    flops = 2 * Bp * (IN_PAD * H1 + H1 * H2 + H2 * H3 + H3 * OUT_PAD)
    weight_bytes = 2 * (w1_p.size + w2_p.size + w3_p.size + w4_p.size)
    bias_bytes = 4 * (b1.size + b2.size + b3.size + b4_p.size)
    bytes_accessed = (2 * x_p.size) + weight_bytes + bias_bytes + 4 * Bp * OUT_PAD

    out = pl.pallas_call(
        generator_kernel,
        out_shape=jax.ShapeDtypeStruct((Bp, OUT_PAD), jnp.float32),
        grid=grid,
        in_specs=in_specs,
        out_specs=out_spec,
        compiler_params=pltpu.CompilerParams(
            dimension_semantics=("parallel",)),
        cost_estimate=pl.CostEstimate(
            flops=flops,
            transcendentals=Bp * OUT_PAD,
            bytes_accessed=bytes_accessed),
    )(x_p, w1_p, b1, w2_p, b2, w3_p, b3, w4_p, b4_p)

    return out[:B, :OUT_DIM]


def init_params(key):
    """Deterministic init mirroring PyTorch nn.Linear default:
    uniform(-1/sqrt(fan_in), 1/sqrt(fan_in)) for both weight and bias."""
    dims = [(IN_DIM, H1), (H1, H2), (H2, H3), (H3, OUT_DIM)]
    params = []
    for (fan_in, fan_out) in dims:
        key, kw, kb = jax.random.split(key, 3)
        bound = 1.0 / jnp.sqrt(jnp.float32(fan_in))
        w = jax.random.uniform(kw, (fan_in, fan_out), jnp.float32, -bound, bound)
        b = jax.random.uniform(kb, (1, fan_out), jnp.float32, -bound, bound)
        params.append((w, b))
    return params


def reference_forward(x, params):
    h = x
    for i, (w, b) in enumerate(params):
        h = h @ w + b
        if i < len(params) - 1:
            h = jnp.maximum(h, 0.0)
        else:
            h = jnp.tanh(h)
    return h


if __name__ == "__main__":
    key = jax.random.PRNGKey(0)
    kx, kx2, kp = jax.random.split(key, 3)

    params = init_params(kp)
    gen = jax.jit(generator_forward)

    # Small batch (exact sublane multiple).
    B = 8
    x = jax.random.normal(kx, (B, IN_DIM), jnp.float32)
    out = jax.block_until_ready(gen(x, params))
    ref = reference_forward(x, params)
    assert out.shape == (B, OUT_DIM), out.shape
    # bf16 matmul operands -> looser tolerance vs the f32 reference.
    assert jnp.allclose(out, ref, atol=3e-2), "mismatch vs reference (B=8)"

    # Batch that is not a multiple of 8 (exercises pad + slice path).
    B2 = 20
    x2 = jax.random.normal(kx2, (B2, IN_DIM), jnp.float32)
    out2 = jax.block_until_ready(gen(x2, params))
    ref2 = reference_forward(x2, params)
    assert out2.shape == (B2, OUT_DIM), out2.shape
    assert jnp.allclose(out2, ref2, atol=3e-2), "mismatch vs reference (B=20)"

    print("KERNEL_OK")
</pallas_src>

<mosaic_0001>
module attributes {stable_mosaic.version = 11 : i64} {
  func.func @generator_kernel(%arg0: i32, %arg1: memref<8x128xbf16, #tpu.memory_space<vmem>>, %arg2: memref<128x128xbf16, #tpu.memory_space<vmem>>, %arg3: memref<1x128xf32, #tpu.memory_space<vmem>>, %arg4: memref<128x256xbf16, #tpu.memory_space<vmem>>, %arg5: memref<1x256xf32, #tpu.memory_space<vmem>>, %arg6: memref<256x512xbf16, #tpu.memory_space<vmem>>, %arg7: memref<1x512xf32, #tpu.memory_space<vmem>>, %arg8: memref<512x896xbf16, #tpu.memory_space<vmem>>, %arg9: memref<1x896xf32, #tpu.memory_space<vmem>>, %arg10: memref<8x896xf32, #tpu.memory_space<vmem>>) attributes {dimension_semantics = [#tpu.dimension_semantics<parallel>], iteration_bounds = array<i64: 1>, scalar_prefetch = 0 : i64, scratch_operands = 0 : i64, tpu.core_type = #tpu.core_type<tc>, window_params = [{transform_indices = @transform_0, window_bounds = array<i64: 8, 128>}, {pipeline_mode = #tpu.pipeline_mode<synchronous>, transform_indices = @transform_1, window_bounds = array<i64: 128, 128>}, {pipeline_mode = #tpu.pipeline_mode<synchronous>, transform_indices = @transform_2, window_bounds = array<i64: 1, 128>}, {pipeline_mode = #tpu.pipeline_mode<synchronous>, transform_indices = @transform_3, window_bounds = array<i64: 128, 256>}, {pipeline_mode = #tpu.pipeline_mode<synchronous>, transform_indices = @transform_4, window_bounds = array<i64: 1, 256>}, {pipeline_mode = #tpu.pipeline_mode<synchronous>, transform_indices = @transform_5, window_bounds = array<i64: 256, 512>}, {pipeline_mode = #tpu.pipeline_mode<synchronous>, transform_indices = @transform_6, window_bounds = array<i64: 1, 512>}, {pipeline_mode = #tpu.pipeline_mode<synchronous>, transform_indices = @transform_7, window_bounds = array<i64: 512, 896>}, {pipeline_mode = #tpu.pipeline_mode<synchronous>, transform_indices = @transform_8, window_bounds = array<i64: 1, 896>}, {transform_indices = @transform_9, window_bounds = array<i64: 8, 896>}]} {
    %c0 = arith.constant 0 : index
    %c0_0 = arith.constant 0 : index
    %0 = vector.load %arg1[%c0, %c0_0] : memref<8x128xbf16, #tpu.memory_space<vmem>>, vector<8x128xbf16>
    %c0_1 = arith.constant 0 : index
    %c0_2 = arith.constant 0 : index
    %1 = vector.load %arg2[%c0_1, %c0_2] : memref<128x128xbf16, #tpu.memory_space<vmem>>, vector<128x128xbf16>
    %cst = arith.constant dense<0.000000e+00> : vector<8x128xf32>
    %2 = tpu.matmul %0, %1, %cst {dimension_numbers = #tpu.dot_dimension_numbers<[1], [0], [0], [1], [0, 0, 1, 1], [], []>} : vector<8x128xbf16>, vector<128x128xbf16>, vector<8x128xf32> -> vector<8x128xf32>
    %c0_3 = arith.constant 0 : index
    %c0_4 = arith.constant 0 : index
    %3 = vector.load %arg3[%c0_3, %c0_4] : memref<1x128xf32, #tpu.memory_space<vmem>>, vector<1x128xf32>
    %4 = vector.broadcast %3 : vector<1x128xf32> to vector<8x128xf32>
    %5 = arith.addf %2, %4 : vector<8x128xf32>
    %cst_5 = arith.constant 0.000000e+00 : f32
    %6 = vector.broadcast %cst_5 : f32 to vector<8x128xf32>
    %7 = arith.maximumf %5, %6 : vector<8x128xf32>
    %8 = arith.truncf %7 : vector<8x128xf32> to vector<8x128xbf16>
    %c0_6 = arith.constant 0 : index
    %c0_7 = arith.constant 0 : index
    %9 = vector.load %arg4[%c0_6, %c0_7] : memref<128x256xbf16, #tpu.memory_space<vmem>>, vector<128x256xbf16>
    %cst_8 = arith.constant dense<0.000000e+00> : vector<8x256xf32>
    %10 = tpu.matmul %8, %9, %cst_8 {dimension_numbers = #tpu.dot_dimension_numbers<[1], [0], [0], [1], [0, 0, 1, 1], [], []>} : vector<8x128xbf16>, vector<128x256xbf16>, vector<8x256xf32> -> vector<8x256xf32>
    %c0_9 = arith.constant 0 : index
    %c0_10 = arith.constant 0 : index
    %11 = vector.load %arg5[%c0_9, %c0_10] : memref<1x256xf32, #tpu.memory_space<vmem>>, vector<1x256xf32>
    %12 = vector.broadcast %11 : vector<1x256xf32> to vector<8x256xf32>
    %13 = arith.addf %10, %12 : vector<8x256xf32>
    %cst_11 = arith.constant 0.000000e+00 : f32
    %14 = vector.broadcast %cst_11 : f32 to vector<8x256xf32>
    %15 = arith.maximumf %13, %14 : vector<8x256xf32>
    %16 = arith.truncf %15 : vector<8x256xf32> to vector<8x256xbf16>
    %c0_12 = arith.constant 0 : index
    %c0_13 = arith.constant 0 : index
    %17 = vector.load %arg6[%c0_12, %c0_13] : memref<256x512xbf16, #tpu.memory_space<vmem>>, vector<256x512xbf16>
    %cst_14 = arith.constant dense<0.000000e+00> : vector<8x512xf32>
    %18 = tpu.matmul %16, %17, %cst_14 {dimension_numbers = #tpu.dot_dimension_numbers<[1], [0], [0], [1], [0, 0, 1, 1], [], []>} : vector<8x256xbf16>, vector<256x512xbf16>, vector<8x512xf32> -> vector<8x512xf32>
    %c0_15 = arith.constant 0 : index
    %c0_16 = arith.constant 0 : index
    %19 = vector.load %arg7[%c0_15, %c0_16] : memref<1x512xf32, #tpu.memory_space<vmem>>, vector<1x512xf32>
    %20 = vector.broadcast %19 : vector<1x512xf32> to vector<8x512xf32>
    %21 = arith.addf %18, %20 : vector<8x512xf32>
    %cst_17 = arith.constant 0.000000e+00 : f32
    %22 = vector.broadcast %cst_17 : f32 to vector<8x512xf32>
    %23 = arith.maximumf %21, %22 : vector<8x512xf32>
    %24 = arith.truncf %23 : vector<8x512xf32> to vector<8x512xbf16>
    %c0_18 = arith.constant 0 : index
    %c0_19 = arith.constant 0 : index
    %25 = vector.load %arg8[%c0_18, %c0_19] : memref<512x896xbf16, #tpu.memory_space<vmem>>, vector<512x896xbf16>
    %cst_20 = arith.constant dense<0.000000e+00> : vector<8x896xf32>
    %26 = tpu.matmul %24, %25, %cst_20 {dimension_numbers = #tpu.dot_dimension_numbers<[1], [0], [0], [1], [0, 0, 1, 1], [], []>} : vector<8x512xbf16>, vector<512x896xbf16>, vector<8x896xf32> -> vector<8x896xf32>
    %c0_21 = arith.constant 0 : index
    %c0_22 = arith.constant 0 : index
    %27 = vector.load %arg9[%c0_21, %c0_22] : memref<1x896xf32, #tpu.memory_space<vmem>>, vector<1x896xf32>
    %28 = vector.broadcast %27 : vector<1x896xf32> to vector<8x896xf32>
    %29 = arith.addf %26, %28 : vector<8x896xf32>
    %30 = math.tanh %29 : vector<8x896xf32>
    %c0_23 = arith.constant 0 : index
    %c0_24 = arith.constant 0 : index
    %31 = vector.load %arg10[%c0_23, %c0_24] : memref<8x896xf32, #tpu.memory_space<vmem>>, vector<8x896xf32>
    tpu.vector_store %arg10[%c0_23, %c0_24], %30 {strides = array<i32>} : memref<8x896xf32, #tpu.memory_space<vmem>>, vector<8x896xf32>,
    return
  }
  func.func @transform_0(%arg0: i32) -> (i32, i32) {
    %c0_i32 = arith.constant 0 : i32
    %c0_i32_0 = arith.constant 0 : i32
    return %arg0, %c0_i32 : i32, i32
  }
  func.func @transform_1(%arg0: i32) -> (i32, i32) {
    %c0_i32 = arith.constant 0 : i32
    %c0_i32_0 = arith.constant 0 : i32
    %c0_i32_1 = arith.constant 0 : i32
    return %c0_i32, %c0_i32_0 : i32, i32
  }
  func.func @transform_2(%arg0: i32) -> (i32, i32) {
    %c0_i32 = arith.constant 0 : i32
    %c0_i32_0 = arith.constant 0 : i32
    %c0_i32_1 = arith.constant 0 : i32
    return %c0_i32, %c0_i32_0 : i32, i32
  }
  func.func @transform_3(%arg0: i32) -> (i32, i32) {
    %c0_i32 = arith.constant 0 : i32
    %c0_i32_0 = arith.constant 0 : i32
    %c0_i32_1 = arith.constant 0 : i32
    return %c0_i32, %c0_i32_0 : i32, i32
  }
  func.func @transform_4(%arg0: i32) -> (i32, i32) {
    %c0_i32 = arith.constant 0 : i32
    %c0_i32_0 = arith.constant 0 : i32
    %c0_i32_1 = arith.constant 0 : i32
    return %c0_i32, %c0_i32_0 : i32, i32
  }
  func.func @transform_5(%arg0: i32) -> (i32, i32) {
    %c0_i32 = arith.constant 0 : i32
    %c0_i32_0 = arith.constant 0 : i32
    %c0_i32_1 = arith.constant 0 : i32
    return %c0_i32, %c0_i32_0 : i32, i32
  }
  func.func @transform_6(%arg0: i32) -> (i32, i32) {
    %c0_i32 = arith.constant 0 : i32
    %c0_i32_0 = arith.constant 0 : i32
    %c0_i32_1 = arith.constant 0 : i32
    return %c0_i32, %c0_i32_0 : i32, i32
  }
  func.func @transform_7(%arg0: i32) -> (i32, i32) {
    %c0_i32 = arith.constant 0 : i32
    %c0_i32_0 = arith.constant 0 : i32
    %c0_i32_1 = arith.constant 0 : i32
    return %c0_i32, %c0_i32_0 : i32, i32
  }
  func.func @transform_8(%arg0: i32) -> (i32, i32) {
    %c0_i32 = arith.constant 0 : i32
    %c0_i32_0 = arith.constant 0 : i32
    %c0_i32_1 = arith.constant 0 : i32
    return %c0_i32, %c0_i32_0 : i32, i32
  }
  func.func @transform_9(%arg0: i32) -> (i32, i32) {
    %c0_i32 = arith.constant 0 : i32
    %c0_i32_0 = arith.constant 0 : i32
    return %arg0, %c0_i32 : i32, i32
  }
}

</mosaic_0001>

<bundles_post_ra>
// kernel: generator_forward.1
= control target key start
LH: loop header
LB: loop body
LE: loop exit
PB: predicated region body
PF: predicated region fallthrough
CT: control target
= control target key end

     0   :  { %s6164_s0 = inlined_call_operand.vmem [shape: bf16[8,128], index: 0, kind: input, shape index: {}]   ;;  %s6165_s1 = inlined_call_operand.vmem [shape: bf16[128,128], index: 1, kind: input, shape index: {}]   ;;  %s6166_s2 = inlined_call_operand.vmem [shape: f32[1,128], index: 2, kind: input, shape index: {}]   ;;  %s6167_s3 = inlined_call_operand.vmem [shape: bf16[128,256], index: 3, kind: input, shape index: {}]   ;;  %s6168_s4 = inlined_call_operand.vmem [shape: f32[1,256], index: 4, kind: input, shape index: {}]   ;;  %s6169_s5 = inlined_call_operand.vmem [shape: bf16[256,512], index: 5, kind: input, shape index: {}]   ;;  %s6170_s6 = inlined_call_operand.vmem [shape: f32[1,512], index: 6, kind: input, shape index: {}]   ;;  %s6171_s7 = inlined_call_operand.vmem [shape: bf16[512,896], index: 7, kind: input, shape index: {}]   ;;  %s6172_s8 = inlined_call_operand.vmem [shape: f32[1,896], index: 8, kind: input, shape index: {}]   ;;  %s6173_s9 = inlined_call_operand.hbm [shape: f32[8,896], index: 9, kind: output, shape index: {}]  }
   0x1   :  { %v3828_v0 = vld [vmem:[%s6165_s1 + $0x38] sm:$0xff]  ;;  %v3827_v1 = vld [vmem:[%s6165_s1 + $0x30] sm:$0xff]  ;;  %v2655_v7 = vld [vmem:[%s6167_s3 + $0x60] sm:$0xf] }
   0x2   :  { %102 = vmatpush.bf16.msra.mxu0 %v3828_v0  ;;  %v2663_v2 = vld [vmem:[%s6167_s3 + $0x70] sm:$0xf]  ;;  %v3844_v3 = vld [vmem:[%s6167_s3 + $0x74] sm:$0xf0]  ;;  %v3843_v4 = vld [vmem:[%s6167_s3 + $0x74] sm:$0xf] }
   0x3   :  { %v2664_v5 = vor.u32 %v3844_v3, %v2663_v2  ;;  %v2665_v6 = vld [vmem:[%s6167_s3 + $0x78] sm:$0xf0]  ;;  %v3842_v8 = vld [vmem:[%s6167_s3 + $0x64] sm:$0xf0]  ;;  %v3841_v10 = vld [vmem:[%s6167_s3 + $0x64] sm:$0xf] }
   0x4   :  { %v2668_v9 = vor.u32 %v3843_v4, %v2665_v6  ;;  %v2657_v11 = vld [vmem:[%s6167_s3 + $0x68] sm:$0xf0]  ;;  %v2656_v13 = vor.u32 %v3842_v8, %v2655_v7  ;;  %v2647_v15 = vld [vmem:[%s6167_s3 + $0x50] sm:$0xf]  ;;  %v3840_v16 = vld [vmem:[%s6167_s3 + $0x54] sm:$0xf0] }
   0x5   :  { %v3826_v12 = vld [vmem:[%s6165_s1 + $0x28] sm:$0xff]  ;;  %219 = vmatpush.bf16.msra.mxu1 %v2664_v5  ;;  %v2660_v14 = vor.u32 %v3841_v10, %v2657_v11  ;;  %v3839_v17 = vld [vmem:[%s6167_s3 + $0x54] sm:$0xf]  ;;  %v2649_v18 = vld [vmem:[%s6167_s3 + $0x58] sm:$0xf0]  ;;  %v2648_v20 = vor.u32 %v3840_v16, %v2647_v15 }
   0x6   :  { %103 = vmatpush.bf16.msra.mxu0 %v3827_v1  ;;  %232 = vmatpush.bf16.msra.mxu2 %v2668_v9  ;;  %v3825_v19 = vld [vmem:[%s6165_s1 + $0x20] sm:$0xff]  ;;  %v2652_v22 = vor.u32 %v3839_v17, %v2649_v18  ;;  %v3838_v23 = vld [vmem:[%s6167_s3 + $0x44] sm:$0xf0] }
   0x7   :  { %v2639_v21 = vld [vmem:[%s6167_s3 + $0x40] sm:$0xf] }
   0x9   :  { %220 = vmatpush.bf16.msra.mxu1 %v2656_v13 }
   0xa   :  { %104 = vmatpush.bf16.msra.mxu0 %v3826_v12  ;;  %233 = vmatpush.bf16.msra.mxu2 %v2660_v14 }
   0xb   :  { %14 = vsyncpa [#allocation3], 0  ;;  %v3837_v24 = vld [vmem:[%s6167_s3 + $0x44] sm:$0xf]  ;;  %v2641_v25 = vld [vmem:[%s6167_s3 + $0x48] sm:$0xf0]  ;;  %v2640_v27 = vor.u32 %v3838_v23, %v2639_v21 }
   0xc   :  { %v3824_v26 = vld [vmem:[%s6165_s1 + $0x18] sm:$0xff]  ;;  %v2644_v28 = vor.u32 %v3837_v24, %v2641_v25  ;;  %v2631_v29 = vld [vmem:[%s6167_s3 + $0x30] sm:$0xf]  ;;  %v3835_v31 = vld [vmem:[%s6167_s3 + $0x34] sm:$0xf]  ;;  %s2564_s26 = sshll.u32 %s6173_s9, 4  ;;  %s2565_s26 = int_to_ptr.hbm [resolvable:$true] %s2564_s26 }
   0xd   :  { %221 = vmatpush.bf16.msra.mxu1 %v2648_v20  ;;  %v3836_v30 = vld [vmem:[%s6167_s3 + $0x34] sm:$0xf0]  ;;  %v2633_v32 = vld [vmem:[%s6167_s3 + $0x38] sm:$0xf0]  ;;  %v3823_v33 = vld [vmem:[%s6165_s1 + $0x10] sm:$0xff] }
   0xe   :  { %105 = vmatpush.bf16.msra.mxu0 %v3825_v19  ;;  %234 = vmatpush.bf16.msra.mxu2 %v2652_v22  ;;  %v2632_v34 = vor.u32 %v3836_v30, %v2631_v29  ;;  %v2636_v35 = vor.u32 %v3835_v31, %v2633_v32  ;;  %v2623_v36 = vld [vmem:[%s6167_s3 + $0x20] sm:$0xf]  ;;  %v3834_v37 = vld [vmem:[%s6167_s3 + $0x24] sm:$0xf0]  ;;  %v3833_v38 = vld [vmem:[%s6167_s3 + $0x24] sm:$0xf] }
   0xf   :  { %v2625_v39 = vld [vmem:[%s6167_s3 + $0x28] sm:$0xf0]  ;;  %v2624_v41 = vor.u32 %v3834_v37, %v2623_v36  ;;  %v3821_v43 = vld [vmem:[%s6165_s1] sm:$0xff]  ;;  %v2615_v45 = vld [vmem:[%s6167_s3 + $0x10] sm:$0xf] }
  0x10   :  { %v3822_v40 = vld [vmem:[%s6165_s1 + $0x8] sm:$0xff]  ;;  %v2628_v42 = vor.u32 %v3833_v38, %v2625_v39  ;;  %v33_v44 = vld [vmem:[%s6164_s0] sm:$0xf]  ;;  %v3832_v46 = vld [vmem:[%s6167_s3 + $0x14] sm:$0xf0] }
  0x11   :  { %222 = vmatpush.bf16.msra.mxu1 %v2640_v27  ;;  %v3831_v47 = vld [vmem:[%s6167_s3 + $0x14] sm:$0xf]  ;;  %v2616_v48 = vor.u32 %v3832_v46, %v2615_v45  ;;  %v2617_v49 = vld [vmem:[%s6167_s3 + $0x18] sm:$0xf0]  ;;  %v2607_v51 = vld [vmem:[%s6167_s3] sm:$0xf] }
  0x12   :  { %106 = vmatpush.bf16.msra.mxu0 %v3824_v26  ;;  %235 = vmatpush.bf16.msra.mxu2 %v2644_v28  ;;  %v2620_v50 = vor.u32 %v3831_v47, %v2617_v49  ;;  %v3830_v52 = vld [vmem:[%s6167_s3 + $0x4] sm:$0xf0]  ;;  %v3829_v53 = vld [vmem:[%s6167_s3 + $0x4] sm:$0xf]  ;;  %v2609_v55 = vld [vmem:[%s6167_s3 + $0x8] sm:$0xf0] }
  0x13   :  { %v2608_v54 = vor.u32 %v3830_v52, %v2607_v51  ;;  %v2612_v56 = vor.u32 %v3829_v53, %v2609_v55  ;;  %v2783_v57 = vld [vmem:[%s6169_s5 + $0xe0] sm:$0xf]  ;;  %v3875_v58 = vld [vmem:[%s6169_s5 + $0xec] sm:$0xf0]  ;;  %v3873_v59 = vld [vmem:[%s6169_s5 + $0xe4] sm:$0xf] }
  0x14   :  { %v2784_v60 = vor.u32 %v3875_v58, %v2783_v57  ;;  %v2785_v61 = vld [vmem:[%s6169_s5 + $0xf0] sm:$0xf0]  ;;  %v2767_v62 = vld [vmem:[%s6169_s5 + $0xc0] sm:$0xf]  ;;  %v3871_v63 = vld [vmem:[%s6169_s5 + $0xcc] sm:$0xf0] }
  0x15   :  { %223 = vmatpush.bf16.msra.mxu1 %v2632_v34  ;;  %v2788_v0 = vor.u32 %v3873_v59, %v2785_v61  ;;  %v3869_v1 = vld [vmem:[%s6169_s5 + $0xc4] sm:$0xf]  ;;  %v2769_v2 = vld [vmem:[%s6169_s5 + $0xd0] sm:$0xf0]  ;;  %v2911_v3 = vld [vmem:[%s6169_s5 + $0x1e0] sm:$0xf]  ;;  %v2768_v4 = vor.u32 %v3871_v63, %v2767_v62 }
  0x16   :  { %107 = vmatpush.bf16.msra.mxu0 %v3823_v33  ;;  %236 = vmatpush.bf16.msra.mxu2 %v2636_v35  ;;  %v3907_v5 = vld [vmem:[%s6169_s5 + $0x1ec] sm:$0xf0]  ;;  %v3905_v6 = vld [vmem:[%s6169_s5 + $0x1e4] sm:$0xf]  ;;  %v2913_v7 = vld [vmem:[%s6169_s5 + $0x1f0] sm:$0xf0]  ;;  %v2772_v8 = vor.u32 %v3869_v1, %v2769_v2 }
  0x17   :  { %643 = vmatpush.bf16.msra.mxu3 %v2784_v60  ;;  %v2912_v9 = vor.u32 %v3907_v5, %v2911_v3  ;;  %v2916_v10 = vor.u32 %v3905_v6, %v2913_v7  ;;  %v2751_v11 = vld [vmem:[%s6169_s5 + $0xa0] sm:$0xf]  ;;  %v3867_v12 = vld [vmem:[%s6169_s5 + $0xac] sm:$0xf0]  ;;  %v3865_v13 = vld [vmem:[%s6169_s5 + $0xa4] sm:$0xf] }
  0x18   :  { %v2753_v14 = vld [vmem:[%s6169_s5 + $0xb0] sm:$0xf0]  ;;  %v2895_v15 = vld [vmem:[%s6169_s5 + $0x1c0] sm:$0xf]  ;;  %v3903_v16 = vld [vmem:[%s6169_s5 + $0x1cc] sm:$0xf0]  ;;  %v2752_v20 = vor.u32 %v3867_v12, %v2751_v11 }
  0x19   :  { %224 = vmatpush.bf16.msra.mxu1 %v2624_v41  ;;  %v2896_v17 = vor.u32 %v3903_v16, %v2895_v15  ;;  %v3901_v18 = vld [vmem:[%s6169_s5 + $0x1c4] sm:$0xf]  ;;  %v2897_v19 = vld [vmem:[%s6169_s5 + $0x1d0] sm:$0xf0]  ;;  %v2735_v22 = vld [vmem:[%s6169_s5 + $0x80] sm:$0xf]  ;;  %v2756_v24 = vor.u32 %v3865_v13, %v2753_v14 }
  0x1a   :  { %108 = vmatpush.bf16.msra.mxu0 %v3822_v40  ;;  %237 = vmatpush.bf16.msra.mxu2 %v2628_v42  ;;  %v2900_v21 = vor.u32 %v3901_v18, %v2897_v19  ;;  %v3863_v23 = vld [vmem:[%s6169_s5 + $0x8c] sm:$0xf0]  ;;  %v2879_v25 = vld [vmem:[%s6169_s5 + $0x1a0] sm:$0xf]  ;;  %v3897_v27 = vld [vmem:[%s6169_s5 + $0x1a4] sm:$0xf] }
  0x1b   :  { %644 = vmatpush.bf16.msra.mxu3 %v2768_v4  ;;  %v3899_v26 = vld [vmem:[%s6169_s5 + $0x1ac] sm:$0xf0]  ;;  %v3861_v28 = vld [vmem:[%s6169_s5 + $0x84] sm:$0xf]  ;;  %v2737_v29 = vld [vmem:[%s6169_s5 + $0x90] sm:$0xf0]  ;;  %v2736_v34 = vor.u32 %v3863_v23, %v2735_v22 }
  0x1c   :  { %v2881_v30 = vld [vmem:[%s6169_s5 + $0x1b0] sm:$0xf0]  ;;  %v2880_v31 = vor.u32 %v3899_v26, %v2879_v25  ;;  %v2863_v33 = vld [vmem:[%s6169_s5 + $0x180] sm:$0xf]  ;;  %v3895_v35 = vld [vmem:[%s6169_s5 + $0x18c] sm:$0xf0]  ;;  %v2740_v38 = vor.u32 %v3861_v28, %v2737_v29 }
  0x1d   :  { %225 = vmatpush.bf16.msra.mxu1 %v2616_v48  ;;  %v2884_v32 = vor.u32 %v3897_v27, %v2881_v30  ;;  %v3893_v36 = vld [vmem:[%s6169_s5 + $0x184] sm:$0xf]  ;;  %v2865_v37 = vld [vmem:[%s6169_s5 + $0x190] sm:$0xf0]  ;;  %v2719_v39 = vld [vmem:[%s6169_s5 + $0x60] sm:$0xf] }
  0x1e   :  { %109 = vmatpush.bf16.msra.mxu0 %v3821_v43  ;;  %238 = vmatpush.bf16.msra.mxu2 %v2620_v50  ;;  %v3859_v40 = vld [vmem:[%s6169_s5 + $0x6c] sm:$0xf0]  ;;  %v3857_v41 = vld [vmem:[%s6169_s5 + $0x64] sm:$0xf]  ;;  %v2721_v42 = vld [vmem:[%s6169_s5 + $0x70] sm:$0xf0]  ;;  %v2864_v43 = vor.u32 %v3895_v35, %v2863_v33 }
  0x1f   :  { %645 = vmatpush.bf16.msra.mxu3 %v2752_v20  ;;  %v2847_v45 = vld [vmem:[%s6169_s5 + $0x160] sm:$0xf]  ;;  %v2720_v46 = vor.u32 %v3859_v40, %v2719_v39  ;;  %v3891_v47 = vld [vmem:[%s6169_s5 + $0x16c] sm:$0xf0]  ;;  %v3889_v48 = vld [vmem:[%s6169_s5 + $0x164] sm:$0xf]  ;;  %v2724_v50 = vor.u32 %v3857_v41, %v2721_v42 }
  0x20   :  { %v2849_v49 = vld [vmem:[%s6169_s5 + $0x170] sm:$0xf0]  ;;  %v2703_v51 = vld [vmem:[%s6169_s5 + $0x40] sm:$0xf]  ;;  %v3855_v52 = vld [vmem:[%s6169_s5 + $0x4c] sm:$0xf0]  ;;  %v2848_v55 = vor.u32 %v3891_v47, %v2847_v45 }
  0x21   :  { %110 = vmatmul.bf16.vlgmr.msra.gmra.mxu0 %v33_v44  ;;  %226 = vmatpush.bf16.msra.mxu1 %v2608_v54  ;;  %v2868_v44 = vor.u32 %v3893_v36, %v2865_v37  ;;  %v3853_v53 = vld [vmem:[%s6169_s5 + $0x44] sm:$0xf]  ;;  %v2705_v54 = vld [vmem:[%s6169_s5 + $0x50] sm:$0xf0]  ;;  %v2831_v57 = vld [vmem:[%s6169_s5 + $0x140] sm:$0xf]  ;;  %v2704_v58 = vor.u32 %v3855_v52, %v2703_v51 }
  0x22   :  { %239 = vmatpush.bf16.msra.mxu2 %v2612_v56  ;;  %656 = vmatpush.bf16.msrb.mxu0 %v2912_v9  ;;  %v2852_v56 = vor.u32 %v3889_v48, %v2849_v49  ;;  %v3887_v59 = vld [vmem:[%s6169_s5 + $0x14c] sm:$0xf0]  ;;  %v3885_v60 = vld [vmem:[%s6169_s5 + $0x144] sm:$0xf]  ;;  %v2833_v61 = vld [vmem:[%s6169_s5 + $0x150] sm:$0xf0]  ;;  %v2708_v62 = vor.u32 %v3853_v53, %v2705_v54 }
  0x23   :  { %646 = vmatpush.bf16.msra.mxu3 %v2736_v34  ;;  %v2687_v63 = vld [vmem:[%s6169_s5 + $0x20] sm:$0xf]  ;;  %v3849_v2 = vld [vmem:[%s6169_s5 + $0x24] sm:$0xf]  ;;  %v2689_v3 = vld [vmem:[%s6169_s5 + $0x30] sm:$0xf0]  ;;  %v2832_v4 = vor.u32 %v3887_v59, %v2831_v57  ;;  %v2836_v5 = vor.u32 %v3885_v60, %v2833_v61 }
  0x24   :  { %v4134_v1 = vld [vmem:[%s6166_s2] ss:$0 sm:$0xff]  ;;  %v3847_v9 = vld [vmem:[%s6169_s5 + $0xc] sm:$0xf0]  ;;  %v3881_v11 = vld [vmem:[%s6169_s5 + $0x124] sm:$0xf]  ;;  %v2692_v14 = vor.u32 %v3849_v2, %v2689_v3 }
  0x25   :  { %669 = vmatpush.bf16.msrb.mxu1 %v2788_v0  ;;  %v3851_v0 = vld [vmem:[%s6169_s5 + $0x2c] sm:$0xf0]  ;;  %v2815_v6 = vld [vmem:[%s6169_s5 + $0x120] sm:$0xf]  ;;  %v2817_v12 = vld [vmem:[%s6169_s5 + $0x130] sm:$0xf0] }
  0x26   :  { %682 = vmatpush.bf16.msrb.mxu2 %v2916_v10  ;;  %657 = vmatpush.bf16.msrb.mxu0 %v2896_v17  ;;  %v2688_v7 = vor.u32 %v3851_v0, %v2687_v63  ;;  %v3883_v10 = vld [vmem:[%s6169_s5 + $0x12c] sm:$0xf0]  ;;  %v3845_v15 = vld [vmem:[%s6169_s5 + $0x4] sm:$0xf]  ;;  %v2673_v16 = vld [vmem:[%s6169_s5 + $0x10] sm:$0xf0]  ;;  %v2820_v23 = vor.u32 %v3881_v11, %v2817_v12 }
  0x27   :  { %647 = vmatpush.bf16.msra.mxu3 %v2720_v46  ;;  %v2791_v17 = vld [vmem:[%s6169_s5 + $0xe8] sm:$0xf]  ;;  %v3876_v19 = vld [vmem:[%s6169_s5 + $0xf4] sm:$0xf0]  ;;  %v3874_v20 = vld [vmem:[%s6169_s5 + $0xec] sm:$0xf]  ;;  %v2816_v22 = vor.u32 %v3883_v10, %v2815_v6 }
  0x28   :  { %v3879_v25 = vld [vmem:[%s6169_s5 + $0x10c] sm:$0xf0]  ;;  %v3877_v26 = vld [vmem:[%s6169_s5 + $0x104] sm:$0xf]  ;;  %v2801_v28 = vld [vmem:[%s6169_s5 + $0x110] sm:$0xf0]  ;;  %v2792_v36 = vor.u32 %v3876_v19, %v2791_v17 }
  0x29   :  { %670 = vmatpush.bf16.msrb.mxu1 %v2772_v8  ;;  %v2671_v8 = vld [vmem:[%s6169_s5] sm:$0xf]  ;;  %v2919_v29 = vld [vmem:[%s6169_s5 + $0x1e8] sm:$0xf]  ;;  %v3906_v33 = vld [vmem:[%s6169_s5 + $0x1ec] sm:$0xf] }
  0x2a   :  { %683 = vmatpush.bf16.msrb.mxu2 %v2900_v21  ;;  %658 = vmatpush.bf16.msrb.mxu0 %v2880_v31  ;;  %v2793_v21 = vld [vmem:[%s6169_s5 + $0xf8] sm:$0xf0]  ;;  %v2672_v30 = vor.u32 %v3847_v9, %v2671_v8  ;;  %v2676_v31 = vor.u32 %v3845_v15, %v2673_v16  ;;  %v3872_v39 = vld [vmem:[%s6169_s5 + $0xd4] sm:$0xf0]  ;;  %v3870_v40 = vld [vmem:[%s6169_s5 + $0xcc] sm:$0xf] }
  0x2b   :  { %648 = vmatpush.bf16.msra.mxu3 %v2704_v58  ;;  %v2921_v34 = vld [vmem:[%s6169_s5 + $0x1f8] sm:$0xf0]  ;;  %v2796_v37 = vor.u32 %v3874_v20, %v2793_v21  ;;  %v2759_v49 = vld [vmem:[%s6169_s5 + $0xa8] sm:$0xf]  ;;  %v3866_v51 = vld [vmem:[%s6169_s5 + $0xac] sm:$0xf] }
  0x2c   :  { %v2777_v41 = vld [vmem:[%s6169_s5 + $0xd8] sm:$0xf0]  ;;  %v2924_v45 = vor.u32 %v3906_v33, %v2921_v34  ;;  %v3902_v57 = vld [vmem:[%s6169_s5 + $0x1cc] sm:$0xf]  ;;  %v2743_v61 = vld [vmem:[%s6169_s5 + $0x88] sm:$0xf] }
  0x2d   :  { %671 = vmatpush.bf16.msrb.mxu1 %v2756_v24  ;;  %v2799_v24 = vld [vmem:[%s6169_s5 + $0x100] sm:$0xf]  ;;  %v2780_v48 = vor.u32 %v3870_v40, %v2777_v41  ;;  %v2761_v53 = vld [vmem:[%s6169_s5 + $0xb8] sm:$0xf0]  ;;  %v3862_v63 = vld [vmem:[%s6169_s5 + $0x8c] sm:$0xf] }
  0x2e   :  { %684 = vmatpush.bf16.msrb.mxu2 %v2884_v32  ;;  %659 = vmatpush.bf16.msrb.mxu0 %v2864_v43  ;;  %v3908_v32 = vld [vmem:[%s6169_s5 + $0x1f4] sm:$0xf0]  ;;  %v2800_v42 = vor.u32 %v3879_v25, %v2799_v24  ;;  %v2804_v43 = vor.u32 %v3877_v26, %v2801_v28  ;;  %v2764_v54 = vor.u32 %v3866_v51, %v2761_v53  ;;  %v2905_v59 = vld [vmem:[%s6169_s5 + $0x1d8] sm:$0xf0]  ;;  %v2887_v3 = vld [vmem:[%s6169_s5 + $0x1a8] sm:$0xf] }
  0x2f   :  { %649 = vmatpush.bf16.msra.mxu3 %v2688_v7  ;;  %v2908_v60 = vor.u32 %v3902_v57, %v2905_v59  ;;  %v2889_v7 = vld [vmem:[%s6169_s5 + $0x1b8] sm:$0xf0]  ;;  %v2727_v9 = vld [vmem:[%s6169_s5 + $0x68] sm:$0xf]  ;;  %v3860_v10 = vld [vmem:[%s6169_s5 + $0x74] sm:$0xf0] }
  0x30   :  { %v2728_v11 = vor.u32 %v3860_v10, %v2727_v9  ;;  %v3858_v12 = vld [vmem:[%s6169_s5 + $0x6c] sm:$0xf]  ;;  %v2871_v15 = vld [vmem:[%s6169_s5 + $0x188] sm:$0xf]  ;;  %v3896_v16 = vld [vmem:[%s6169_s5 + $0x194] sm:$0xf0] }
  0x31   :  { %672 = vmatpush.bf16.msrb.mxu1 %v2740_v38  ;;  %v2775_v38 = vld [vmem:[%s6169_s5 + $0xc8] sm:$0xf]  ;;  %v3894_v17 = vld [vmem:[%s6169_s5 + $0x18c] sm:$0xf]  ;;  %v2873_v19 = vld [vmem:[%s6169_s5 + $0x198] sm:$0xf0] }
  0x32   :  { %685 = vmatpush.bf16.msrb.mxu2 %v2868_v44  ;;  %660 = vmatpush.bf16.msrb.mxu0 %v2848_v55  ;;  %v2920_v44 = vor.u32 %v3908_v32, %v2919_v29  ;;  %v2776_v47 = vor.u32 %v3872_v39, %v2775_v38  ;;  %v2903_v55 = vld [vmem:[%s6169_s5 + $0x1c8] sm:$0xf]  ;;  %v2876_v20 = vor.u32 %v3894_v17, %v2873_v19  ;;  %v2713_v25 = vld [vmem:[%s6169_s5 + $0x58] sm:$0xf0]  ;;  %v3892_v28 = vld [vmem:[%s6169_s5 + $0x174] sm:$0xf0] }
  0x33   :  { %650 = vmatpush.bf16.msra.mxu3 %v2672_v30  ;;  %v2711_v21 = vld [vmem:[%s6169_s5 + $0x48] sm:$0xf]  ;;  %v3890_v29 = vld [vmem:[%s6169_s5 + $0x16c] sm:$0xf]  ;;  %v3852_v34 = vld [vmem:[%s6169_s5 + $0x34] sm:$0xf0] }
  0x34   :  { %v2695_v33 = vld [vmem:[%s6169_s5 + $0x28] sm:$0xf]  ;;  %v3888_v39 = vld [vmem:[%s6169_s5 + $0x154] sm:$0xf0]  ;;  %v3882_v53 = vld [vmem:[%s6169_s5 + $0x12c] sm:$0xf] }
  0x35   :  { %673 = vmatpush.bf16.msrb.mxu1 %v2724_v50  ;;  %v3868_v50 = vld [vmem:[%s6169_s5 + $0xb4] sm:$0xf0]  ;;  %v2839_v38 = vld [vmem:[%s6169_s5 + $0x148] sm:$0xf]  ;;  %v3878_v59 = vld [vmem:[%s6169_s5 + $0x10c] sm:$0xf] }
  0x36   :  { %686 = vmatpush.bf16.msrb.mxu2 %v2852_v56  ;;  %661 = vmatpush.bf16.msrb.mxu0 %v2832_v4  ;;  %v2760_v52 = vor.u32 %v3868_v50, %v2759_v49  ;;  %v3904_v56 = vld [vmem:[%s6169_s5 + $0x1d4] sm:$0xf0]  ;;  %v2840_v41 = vor.u32 %v3888_v39, %v2839_v38  ;;  %v2823_v51 = vld [vmem:[%s6169_s5 + $0x128] sm:$0xf]  ;;  %v3095_v10 = vld [vmem:[%s6171_s7 + $0x150] sm:$0xf] }
  0x37   :  { %695 = vmatpush.bf16.msrb.mxu3 %v2792_v36  ;;  %v2904_v58 = vor.u32 %v3904_v56, %v2903_v55  ;;  %v3900_v4 = vld [vmem:[%s6169_s5 + $0x1b4] sm:$0xf0]  ;;  %v2696_v36 = vor.u32 %v3852_v34, %v2695_v33  ;;  %v2825_v55 = vld [vmem:[%s6169_s5 + $0x138] sm:$0xf0]  ;;  %v2807_v57 = vld [vmem:[%s6169_s5 + $0x108] sm:$0xf] }
  0x38   :  { %v2888_v6 = vor.u32 %v3900_v4, %v2887_v3  ;;  %v2828_v56 = vor.u32 %v3882_v53, %v2825_v55  ;;  %v3123_v3 = vld [vmem:[%s6171_s7 + $0x188] sm:$0xf]  ;;  %v3961_v4 = vld [vmem:[%s6171_s7 + $0x1a0] sm:$0xf0]  ;;  %v4010_v34 = vld [vmem:[%s6171_s7 + $0x328] sm:$0xf0] }
  0x39   :  { %674 = vmatpush.bf16.msrb.mxu1 %v2708_v62  ;;  %v3864_v62 = vld [vmem:[%s6169_s5 + $0x94] sm:$0xf0]  ;;  %v3124_v9 = vor.u32 %v3961_v4, %v3123_v3  ;;  %v3347_v17 = vld [vmem:[%s6171_s7 + $0x348] sm:$0xf]  ;;  %v4017_v19 = vld [vmem:[%s6171_s7 + $0x360] sm:$0xf0] }
  0x3a   :  { %687 = vmatpush.bf16.msrb.mxu2 %v2836_v5  ;;  %662 = vmatpush.bf16.msrb.mxu0 %v2816_v22  ;;  %v2744_v0 = vor.u32 %v3864_v62, %v2743_v61  ;;  %v3898_v5 = vld [vmem:[%s6169_s5 + $0x1ac] sm:$0xf]  ;;  %v3856_v22 = vld [vmem:[%s6169_s5 + $0x54] sm:$0xf0]  ;;  %v2809_v61 = vld [vmem:[%s6169_s5 + $0x118] sm:$0xf0] }
  0x3b   :  { %696 = vmatpush.bf16.msrb.mxu3 %v2776_v47  ;;  %v2892_v8 = vor.u32 %v3898_v5, %v2889_v7  ;;  %v2712_v24 = vor.u32 %v3856_v22, %v2711_v21  ;;  %v3846_v47 = vld [vmem:[%s6169_s5 + $0xc] sm:$0xf]  ;;  %v2812_v62 = vor.u32 %v3878_v59, %v2809_v61  ;;  %v3571_v7 = vld [vmem:[%s6171_s7 + $0x508] sm:$0xf]  ;;  %v4129_v21 = vld [vmem:[%s6171_s7 + $0x6e0] sm:$0xf0] }
  0x3c   :  { %v3039_v38 = vld [vmem:[%s6171_s7 + $0xe0] sm:$0xf]  ;;  %v3933_v53 = vld [vmem:[%s6171_s7 + $0xc0] sm:$0xf0]  ;;  %v3996_v59 = vld [vmem:[%s6171_s7 + $0x2b8] sm:$0xf0] }
  0x3d   :  { %675 = vmatpush.bf16.msrb.mxu1 %v2692_v14  ;;  %v4045_v55 = vld [vmem:[%s6171_s7 + $0x440] sm:$0xf0]  ;;  %v4108_v61 = vld [vmem:[%s6171_s7 + $0x638] sm:$0xf0]  ;;  %v4038_v3 = vld [vmem:[%s6171_s7 + $0x408] sm:$0xf0] }
  0x3e   :  { %688 = vmatpush.bf16.msrb.mxu2 %v2820_v23  ;;  %663 = vmatpush.bf16.msrb.mxu0 %v2800_v42  ;;  %v3854_v23 = vld [vmem:[%s6169_s5 + $0x4c] sm:$0xf] }
  0x3f   :  { %697 = vmatpush.bf16.msrb.mxu3 %v2760_v52  ;;  %v2716_v26 = vor.u32 %v3854_v23, %v2713_v25  ;;  %v3886_v42 = vld [vmem:[%s6169_s5 + $0x14c] sm:$0xf]  ;;  %v3884_v52 = vld [vmem:[%s6169_s5 + $0x134] sm:$0xf0]  ;;  %v3947_v25 = vld [vmem:[%s6171_s7 + $0x130] sm:$0xf0] }
  0x41   :  { %676 = vmatpush.bf16.msrb.mxu1 %v2676_v31  ;;  %v2857_v31 = vld [vmem:[%s6169_s5 + $0x178] sm:$0xf0] }
  0x42   :  { %689 = vmatpush.bf16.msrb.mxu2 %v2804_v43  ;;  %708 = vmatpush.bf16.msra.mxu0 %v2920_v44  ;;  %v2860_v32 = vor.u32 %v3890_v29, %v2857_v31  ;;  %v2841_v43 = vld [vmem:[%s6169_s5 + $0x158] sm:$0xf0]  ;;  %v2679_v44 = vld [vmem:[%s6169_s5 + $0x8] sm:$0xf]  ;;  %v4059_v29 = vld [vmem:[%s6171_s7 + $0x4b0] sm:$0xf0] }
  0x43   :  { %698 = vmatpush.bf16.msrb.mxu3 %v2744_v0  ;;  %v3319_v31 = vld [vmem:[%s6171_s7 + $0x310] sm:$0xf] }
  0x46   :  { %709 = vmatpush.bf16.msra.mxu0 %v2904_v58  ;;  %v3880_v58 = vld [vmem:[%s6169_s5 + $0x114] sm:$0xf0] }
  0x47   :  { %699 = vmatpush.bf16.msrb.mxu3 %v2728_v11 }
  0x4a   :  { %710 = vmatpush.bf16.msra.mxu0 %v2888_v6 }
  0x4b   :  { %700 = vmatpush.bf16.msrb.mxu3 %v2712_v24  ;;  %v3067_v24 = vld [vmem:[%s6171_s7 + $0x118] sm:$0xf] }
  0x4f   :  { %701 = vmatpush.bf16.msrb.mxu3 %v2696_v36  ;;  %v4122_v36 = vld [vmem:[%s6171_s7 + $0x6a8] sm:$0xf0] }
  0x9e   :  { %v111_v13 = vpop.f32.mrf.mxu0 }
  0x9f   :  { %v112_v18 = vadd.f32 %v4134_v1, %v111_v13  ;;  %v2745_v1 = vld [vmem:[%s6169_s5 + $0x98] sm:$0xf0] }
  0xa0   :  { %v2748_v2 = vor.u32 %v3862_v63, %v2745_v1  ;;  %v2729_v13 = vld [vmem:[%s6169_s5 + $0x78] sm:$0xf0]  ;;  %v133_v63 = vld [vmem:[%s6168_s4] sm:$0x3] }
  0xa1   :  { %v115_v27 = vmax.f32 %v112_v18, 0.0  ;;  %v2732_v14 = vor.u32 %v3858_v12, %v2729_v13  ;;  %v2872_v18 = vor.u32 %v3896_v16, %v2871_v15  ;;  %v135_v0 = vperm.slane %v133_v63, 0  ;;  %v3954_v13 = vld [vmem:[%s6171_s7 + $0x168] sm:$0xf0] }
  0xa2   :  { %v136_v6 = vperm.slane %v133_v63, 1  ;;  %v4066_v15 = vld [vmem:[%s6171_s7 + $0x4e8] sm:$0xf0]  ;;  %v3096_v23 = vor.u32 %v3954_v13, %v3095_v10  ;;  %v2983_v63 = vld [vmem:[%s6171_s7 + $0x70] sm:$0xf] }
  0xa3   :  { %v116_v35 = vpack.c.bf16 %v115_v27, %v115_v27  ;;  %711 = vmatpush.bf16.msra.mxu0 %v2872_v18  ;;  %v2855_v27 = vld [vmem:[%s6169_s5 + $0x168] sm:$0xf]  ;;  %v3919_v13 = vld [vmem:[%s6171_s7 + $0x50] sm:$0xf0] }
  0xa4   :  { %v2856_v30 = vor.u32 %v3892_v28, %v2855_v27  ;;  %v3515_v28 = vld [vmem:[%s6171_s7 + $0x498] sm:$0xf] }
  0xa5   :  { %227 = vmatmul.bf16.vlgmr.msra.gmra.mxu1 %v116_v35  ;;  %240 = vmatmul.bf16.vlgmr.msra.gmra.mxu2 %v116_v35  ;;  %v3850_v35 = vld [vmem:[%s6169_s5 + $0x2c] sm:$0xf]  ;;  %v3516_v39 = vor.u32 %v4059_v29, %v3515_v28  ;;  %v3125_v28 = vld [vmem:[%s6171_s7 + $0x1a4] sm:$0xf0] }
  0xa6   :  { %v113_v46 = vpop.f32.mrf.mxu0  ;;  %721 = vmatpush.bf16.msra.mxu1 %v2796_v37  ;;  %734 = vmatpush.bf16.msra.mxu2 %v2924_v45  ;;  %v2697_v37 = vld [vmem:[%s6169_s5 + $0x38] sm:$0xf0]  ;;  %v2844_v45 = vor.u32 %v3886_v42, %v2841_v43 }
  0xa7   :  { %712 = vmatpush.bf16.msra.mxu0 %v2856_v30  ;;  %v2700_v40 = vor.u32 %v3850_v35, %v2697_v37  ;;  %v3848_v46 = vld [vmem:[%s6169_s5 + $0x14] sm:$0xf0]  ;;  %v3348_v30 = vor.u32 %v4017_v19, %v3347_v17  ;;  %v3767_v35 = vld [vmem:[%s6171_s7 + $0x690] sm:$0xf]  ;;  %v3068_v37 = vor.u32 %v3947_v25, %v3067_v24  ;;  %v4052_v42 = vld [vmem:[%s6171_s7 + $0x478] sm:$0xf0] }
  0xa8   :  { %v2680_v49 = vor.u32 %v3848_v46, %v2679_v44  ;;  %v3320_v44 = vor.u32 %v4010_v34, %v3319_v31  ;;  %v3768_v46 = vor.u32 %v4122_v36, %v3767_v35  ;;  %v3207_v17 = vld [vmem:[%s6171_s7 + $0x230] sm:$0xf]  ;;  %v3982_v19 = vld [vmem:[%s6171_s7 + $0x248] sm:$0xf0]  ;;  %v2927_v24 = vld [vmem:[%s6171_s7] sm:$0xf] }
  0xa9   :  { %v3912_v25 = vld [vmem:[%s6171_s7 + $0x18] sm:$0xf0]  ;;  %v3975_v31 = vld [vmem:[%s6171_s7 + $0x210] sm:$0xf0]  ;;  %v3097_v36 = vld [vmem:[%s6171_s7 + $0x16c] sm:$0xf0] }
  0xaa   :  { %722 = vmatpush.bf16.msra.mxu1 %v2780_v48  ;;  %735 = vmatpush.bf16.msra.mxu2 %v2908_v60  ;;  %v2681_v48 = vld [vmem:[%s6169_s5 + $0x18] sm:$0xf0]  ;;  %v2808_v60 = vor.u32 %v3880_v58, %v2807_v57  ;;  %v3263_v57 = vld [vmem:[%s6171_s7 + $0x2a0] sm:$0xf]  ;;  %v3951_v35 = vld [vmem:[%s6171_s7 + $0x154] sm:$0xf] }
  0xab   :  { %v2684_v50 = vor.u32 %v3846_v47, %v2681_v48  ;;  %713 = vmatpush.bf16.msra.mxu0 %v2840_v41  ;;  %702 = vmatpush.bf16.msrb.mxu3 %v2680_v49  ;;  %v3487_v41 = vld [vmem:[%s6171_s7 + $0x460] sm:$0xf]  ;;  %v4003_v47 = vld [vmem:[%s6171_s7 + $0x2f0] sm:$0xf0]  ;;  %v3739_v48 = vld [vmem:[%s6171_s7 + $0x658] sm:$0xf]  ;;  %v3264_v4 = vor.u32 %v3996_v59, %v3263_v57 }
  0xac   :  { %v4115_v49 = vld [vmem:[%s6171_s7 + $0x670] sm:$0xf0]  ;;  %v4024_v57 = vld [vmem:[%s6171_s7 + $0x398] sm:$0xf0] }
  0xad   :  { %v3740_v58 = vor.u32 %v4115_v49, %v3739_v48  ;;  %v3937_v49 = vld [vmem:[%s6171_s7 + $0xe4] sm:$0xf] }
  0xae   :  { %723 = vmatpush.bf16.msra.mxu1 %v2764_v54  ;;  %736 = vmatpush.bf16.msra.mxu2 %v2892_v8  ;;  %v2824_v54 = vor.u32 %v3884_v52, %v2823_v51  ;;  %v4073_v8 = vld [vmem:[%s6171_s7 + $0x520] sm:$0xf0]  ;;  %v3011_v51 = vld [vmem:[%s6171_s7 + $0xa8] sm:$0xf]  ;;  %v3488_v52 = vor.u32 %v4052_v42, %v3487_v41  ;;  %v3100_v41 = vor.u32 %v3951_v35, %v3097_v36  ;;  %v2929_v35 = vld [vmem:[%s6171_s7 + $0x1c] sm:$0xf0] }
  0xaf   :  { %v3572_v11 = vor.u32 %v4073_v8, %v3571_v7  ;;  %v3989_v7 = vld [vmem:[%s6171_s7 + $0x280] sm:$0xf0]  ;;  %v3683_v8 = vld [vmem:[%s6171_s7 + $0x5e8] sm:$0xf]  ;;  %v3972_v36 = vld [vmem:[%s6171_s7 + $0x1fc] sm:$0xf] }
  0xb0   :  { %714 = vmatpush.bf16.msra.mxu0 %v2824_v54  ;;  %v3459_v54 = vld [vmem:[%s6171_s7 + $0x428] sm:$0xf] }
  0xb2   :  { %724 = vmatpush.bf16.msra.mxu1 %v2748_v2  ;;  %737 = vmatpush.bf16.msra.mxu2 %v2876_v20  ;;  %v3795_v20 = vld [vmem:[%s6171_s7 + $0x6c8] sm:$0xf] }
  0xb4   :  { %715 = vmatpush.bf16.msra.mxu0 %v2808_v60  ;;  %v3711_v60 = vld [vmem:[%s6171_s7 + $0x620] sm:$0xf] }
  0xb6   :  { %725 = vmatpush.bf16.msra.mxu1 %v2732_v14  ;;  %738 = vmatpush.bf16.msra.mxu2 %v2860_v32  ;;  %v3543_v14 = vld [vmem:[%s6171_s7 + $0x4d0] sm:$0xf]  ;;  %v3796_v32 = vor.u32 %v4129_v21, %v3795_v20  ;;  %v4094_v21 = vld [vmem:[%s6171_s7 + $0x5c8] sm:$0xf0] }
  0xb7   :  { %v3655_v20 = vld [vmem:[%s6171_s7 + $0x5b0] sm:$0xf] }
  0xb8   :  { %v3656_v29 = vor.u32 %v4094_v21, %v3655_v20  ;;  %v3797_v20 = vld [vmem:[%s6171_s7 + $0x6e4] sm:$0xf0] }
  0xba   :  { %726 = vmatpush.bf16.msra.mxu1 %v2716_v26  ;;  %739 = vmatpush.bf16.msra.mxu2 %v2844_v45  ;;  %v3544_v26 = vor.u32 %v4066_v15, %v3543_v14  ;;  %v3291_v45 = vld [vmem:[%s6171_s7 + $0x2d8] sm:$0xf]  ;;  %v4031_v15 = vld [vmem:[%s6171_s7 + $0x3d0] sm:$0xf0] }
  0xbb   :  { %v3403_v14 = vld [vmem:[%s6171_s7 + $0x3b8] sm:$0xf] }
  0xbe   :  { %727 = vmatpush.bf16.msra.mxu1 %v2700_v40  ;;  %740 = vmatpush.bf16.msra.mxu2 %v2828_v56  ;;  %v3940_v40 = vld [vmem:[%s6171_s7 + $0xf8] sm:$0xf0]  ;;  %v3292_v56 = vor.u32 %v4003_v47, %v3291_v45  ;;  %v3321_v47 = vld [vmem:[%s6171_s7 + $0x32c] sm:$0xf0] }
  0xc2   :  { %728 = vmatpush.bf16.msra.mxu1 %v2684_v50  ;;  %741 = vmatpush.bf16.msra.mxu2 %v2812_v62  ;;  %v3040_v50 = vor.u32 %v3940_v40, %v3039_v38  ;;  %v3012_v62 = vor.u32 %v3933_v53, %v3011_v51  ;;  %v3968_v38 = vld [vmem:[%s6171_s7 + $0x1d8] sm:$0xf0]  ;;  %v3349_v40 = vld [vmem:[%s6171_s7 + $0x364] sm:$0xf0]  ;;  %v3293_v53 = vld [vmem:[%s6171_s7 + $0x2f4] sm:$0xf0] }
 0x122   :  { %v228_v1 = vpop.f32.mrf.mxu1 }
 0x123   :  { %v229_v2 = vadd.f32 %v228_v1, %v135_v0  ;;  %v3460_v0 = vor.u32 %v4045_v55, %v3459_v54  ;;  %v3926_v1 = vld [vmem:[%s6171_s7 + $0x88] sm:$0xf0] }
 0x124   :  { %v2984_v10 = vor.u32 %v3926_v1, %v2983_v63  ;;  %v3993_v1 = vld [vmem:[%s6171_s7 + $0x2a4] sm:$0xf] }
 0x125   :  { %v245_v5 = vmax.f32 %v229_v2, 0.0  ;;  %v3431_v2 = vld [vmem:[%s6171_s7 + $0x3f0] sm:$0xf] }
 0x127   :  { %v4754_v12 = vpack.c.bf16 %v245_v5, %v245_v5  ;;  %v3235_v5 = vld [vmem:[%s6171_s7 + $0x268] sm:$0xf] }
 0x128   :  { %v241_v16 = vpop.f32.mrf.mxu2 }
 0x129   :  { %v242_v18 = vadd.f32 %v241_v16, %v136_v6  ;;  %651 = vmatmul.bf16.vlgmr.msra.gmra.mxu3 %v4754_v12  ;;  %677 = vmatmul.bf16.vlgmr.msrb.gmra.mxu1 %v4754_v12  ;;  %v3712_v6 = vor.u32 %v4108_v61, %v3711_v60  ;;  %v3236_v16 = vor.u32 %v3989_v7, %v3235_v5  ;;  %v4087_v60 = vld [vmem:[%s6171_s7 + $0x590] sm:$0xf0]  ;;  %v3930_v61 = vld [vmem:[%s6171_s7 + $0xac] sm:$0xf]  ;;  %v3573_v5 = vld [vmem:[%s6171_s7 + $0x524] sm:$0xf0] }
 0x12a   :  { %v230_v22 = vpop.f32.mrf.mxu1  ;;  %2179 = vmatpush.bf16.msra.mxu3 %v3124_v9  ;;  %2205 = vmatpush.bf16.msrb.mxu1 %v3572_v11  ;;  %v4101_v9 = vld [vmem:[%s6171_s7 + $0x600] sm:$0xf0]  ;;  %v2955_v11 = vld [vmem:[%s6171_s7 + $0x38] sm:$0xf]  ;;  %v4080_v7 = vld [vmem:[%s6171_s7 + $0x558] sm:$0xf0] }
 0x12b   :  { %v246_v27 = vmax.f32 %v242_v18, 0.0  ;;  %v3684_v18 = vor.u32 %v4101_v9, %v3683_v8  ;;  %v2956_v22 = vor.u32 %v3919_v13, %v2955_v11  ;;  %v2985_v11 = vld [vmem:[%s6171_s7 + $0x8c] sm:$0xf0] }
 0x12d   :  { %v4794_v33 = vpack.c.bf16 %v246_v27, %v246_v27  ;;  %v3958_v27 = vld [vmem:[%s6171_s7 + $0x18c] sm:$0xf] }
 0x12e   :  { %2180 = vmatpush.bf16.msra.mxu3 %v3096_v23  ;;  %2206 = vmatpush.bf16.msrb.mxu1 %v3544_v26  ;;  %v3404_v23 = vor.u32 %v4031_v15, %v3403_v14  ;;  %v3208_v26 = vor.u32 %v3982_v19, %v3207_v17  ;;  %v3237_v14 = vld [vmem:[%s6171_s7 + $0x284] sm:$0xf0]  ;;  %v4063_v15 = vld [vmem:[%s6171_s7 + $0x4d4] sm:$0xf]  ;;  %v4126_v19 = vld [vmem:[%s6171_s7 + $0x6cc] sm:$0xf] }
 0x12f   :  { %664 = vmatmul.bf16.vlgmr.msrb.gmra.mxu0 %v4794_v33  ;;  %690 = vmatmul.bf16.vlgmr.msrb.gmra.mxu2 %v4794_v33  ;;  %v3800_v21 = vor.u32 %v4126_v19, %v3797_v20 }
 0x130   :  { %v243_v43 = vpop.f32.mrf.mxu2  ;;  %2192 = vmatpush.bf16.msrb.mxu0 %v3348_v30  ;;  %2218 = vmatpush.bf16.msrb.mxu2 %v3796_v32  ;;  %v3179_v30 = vld [vmem:[%s6171_s7 + $0x1f8] sm:$0xf]  ;;  %v2928_v32 = vor.u32 %v3912_v25, %v2927_v24  ;;  %v3979_v24 = vld [vmem:[%s6171_s7 + $0x234] sm:$0xf] }
 0x131   :  { %v3180_v34 = vor.u32 %v3975_v31, %v3179_v30  ;;  %v3944_v43 = vld [vmem:[%s6171_s7 + $0x11c] sm:$0xf]  ;;  %v4119_v31 = vld [vmem:[%s6171_s7 + $0x694] sm:$0xf] }
 0x132   :  { %2181 = vmatpush.bf16.msra.mxu3 %v3068_v37  ;;  %2207 = vmatpush.bf16.msrb.mxu1 %v3516_v39  ;;  %v3151_v37 = vld [vmem:[%s6171_s7 + $0x1c0] sm:$0xf]  ;;  %v4014_v39 = vld [vmem:[%s6171_s7 + $0x34c] sm:$0xf] }
 0x133   :  { %v3152_v42 = vor.u32 %v3968_v38, %v3151_v37  ;;  %v3352_v45 = vor.u32 %v4014_v39, %v3349_v40  ;;  %v3181_v38 = vld [vmem:[%s6171_s7 + $0x214] sm:$0xf0]  ;;  %v4049_v39 = vld [vmem:[%s6171_s7 + $0x464] sm:$0xf]  ;;  %v3489_v40 = vld [vmem:[%s6171_s7 + $0x47c] sm:$0xf0] }
 0x134   :  { %2193 = vmatpush.bf16.msrb.mxu0 %v3320_v44  ;;  %2219 = vmatpush.bf16.msrb.mxu2 %v3768_v46  ;;  %v3069_v44 = vld [vmem:[%s6171_s7 + $0x134] sm:$0xf0]  ;;  %v4007_v46 = vld [vmem:[%s6171_s7 + $0x314] sm:$0xf] }
 0x135   :  { %v3072_v48 = vor.u32 %v3944_v43, %v3069_v44  ;;  %v3324_v51 = vor.u32 %v4007_v46, %v3321_v47  ;;  %v4112_v43 = vld [vmem:[%s6171_s7 + $0x65c] sm:$0xf]  ;;  %v3741_v44 = vld [vmem:[%s6171_s7 + $0x674] sm:$0xf0]  ;;  %v3965_v46 = vld [vmem:[%s6171_s7 + $0x1c4] sm:$0xf] }
 0x136   :  { %2182 = vmatpush.bf16.msra.mxu3 %v3040_v50  ;;  %2208 = vmatpush.bf16.msrb.mxu1 %v3488_v52  ;;  %v3041_v50 = vld [vmem:[%s6171_s7 + $0xfc] sm:$0xf0]  ;;  %v4000_v52 = vld [vmem:[%s6171_s7 + $0x2dc] sm:$0xf] }
 0x137   :  { %v3044_v54 = vor.u32 %v3937_v49, %v3041_v50  ;;  %v3296_v55 = vor.u32 %v4000_v52, %v3293_v53  ;;  %v3153_v47 = vld [vmem:[%s6171_s7 + $0x1dc] sm:$0xf0]  ;;  %v4042_v49 = vld [vmem:[%s6171_s7 + $0x42c] sm:$0xf]  ;;  %v3461_v50 = vld [vmem:[%s6171_s7 + $0x444] sm:$0xf0] }
 0x138   :  { %2194 = vmatpush.bf16.msrb.mxu0 %v3292_v56  ;;  %2220 = vmatpush.bf16.msrb.mxu2 %v3740_v58  ;;  %v3375_v56 = vld [vmem:[%s6171_s7 + $0x380] sm:$0xf]  ;;  %v3627_v58 = vld [vmem:[%s6171_s7 + $0x578] sm:$0xf]  ;;  %v3464_v52 = vor.u32 %v4042_v49, %v3461_v50  ;;  %v3941_v49 = vld [vmem:[%s6171_s7 + $0x100] sm:$0xf0] }
 0x139   :  { %703 = vmatmul.bf16.vlgmr.msrb.gmra.mxu3 %v4754_v12  ;;  %729 = vmatmul.bf16.vlgmr.msra.gmra.mxu1 %v4754_v12  ;;  %v3432_v12 = vor.u32 %v4038_v3, %v3431_v2  ;;  %v3376_v59 = vor.u32 %v4024_v57, %v3375_v56  ;;  %v3628_v63 = vor.u32 %v4087_v60, %v3627_v58  ;;  %v3265_v2 = vld [vmem:[%s6171_s7 + $0x2bc] sm:$0xf0]  ;;  %v4070_v3 = vld [vmem:[%s6171_s7 + $0x50c] sm:$0xf]  ;;  %v3433_v56 = vld [vmem:[%s6171_s7 + $0x40c] sm:$0xf0] }
 0x13a   :  { %2183 = vmatpush.bf16.msra.mxu3 %v3012_v62  ;;  %2209 = vmatpush.bf16.msrb.mxu1 %v3460_v0  ;;  %v3013_v62 = vld [vmem:[%s6171_s7 + $0xc4] sm:$0xf0]  ;;  %v3576_v8 = vor.u32 %v4070_v3, %v3573_v5  ;;  %v3713_v53 = vld [vmem:[%s6171_s7 + $0x63c] sm:$0xf0]  ;;  %v4098_v58 = vld [vmem:[%s6171_s7 + $0x5ec] sm:$0xf] }
 0x13b   :  { %v3016_v0 = vor.u32 %v3930_v61, %v3013_v62  ;;  %v4028_v61 = vld [vmem:[%s6171_s7 + $0x3bc] sm:$0xf]  ;;  %v3405_v62 = vld [vmem:[%s6171_s7 + $0x3d4] sm:$0xf0]  ;;  %v4021_v3 = vld [vmem:[%s6171_s7 + $0x384] sm:$0xf] }
 0x13c   :  { %2195 = vmatpush.bf16.msrb.mxu0 %v3264_v4  ;;  %2221 = vmatpush.bf16.msrb.mxu2 %v3712_v6  ;;  %v3268_v4 = vor.u32 %v3993_v1, %v3265_v2  ;;  %v3599_v6 = vld [vmem:[%s6171_s7 + $0x540] sm:$0xf]  ;;  %v3657_v1 = vld [vmem:[%s6171_s7 + $0x5cc] sm:$0xf0]  ;;  %v4084_v5 = vld [vmem:[%s6171_s7 + $0x57c] sm:$0xf] }
 0x13d   :  { %v3600_v9 = vor.u32 %v4080_v7, %v3599_v6  ;;  %v3629_v7 = vld [vmem:[%s6171_s7 + $0x594] sm:$0xf0]  ;;  %v3299_v50 = vld [vmem:[%s6171_s7 + $0x2e0] sm:$0xf] }
 0x13e   :  { %2184 = vmatpush.bf16.msra.mxu3 %v2984_v10  ;;  %2210 = vmatpush.bf16.msrb.mxu1 %v3432_v12  ;;  %v3923_v10 = vld [vmem:[%s6171_s7 + $0x74] sm:$0xf]  ;;  %v3986_v12 = vld [vmem:[%s6171_s7 + $0x26c] sm:$0xf] }
 0x13f   :  { %716 = vmatmul.bf16.vlgmr.msra.gmra.mxu0 %v4794_v33  ;;  %742 = vmatmul.bf16.vlgmr.msra.gmra.mxu2 %v4794_v33  ;;  %v3128_v33 = vor.u32 %v3958_v27, %v3125_v28  ;;  %v2988_v13 = vor.u32 %v3923_v10, %v2985_v11  ;;  %v3240_v17 = vor.u32 %v3986_v12, %v3237_v14  ;;  %v4056_v27 = vld [vmem:[%s6171_s7 + $0x49c] sm:$0xf]  ;;  %v3517_v28 = vld [vmem:[%s6171_s7 + $0x4b4] sm:$0xf0]  ;;  %v4077_v10 = vld [vmem:[%s6171_s7 + $0x544] sm:$0xf] }
 0x140   :  { %2196 = vmatpush.bf16.msrb.mxu0 %v3236_v16  ;;  %2222 = vmatpush.bf16.msrb.mxu2 %v3684_v18  ;;  %v3545_v16 = vld [vmem:[%s6171_s7 + $0x4ec] sm:$0xf0]  ;;  %v3520_v30 = vor.u32 %v4056_v27, %v3517_v28  ;;  %v3601_v11 = vld [vmem:[%s6171_s7 + $0x55c] sm:$0xf0]  ;;  %v3103_v27 = vld [vmem:[%s6171_s7 + $0x158] sm:$0xf] }
 0x141   :  { %v3548_v18 = vor.u32 %v4063_v15, %v3545_v16  ;;  %v5138_v12 = vld [vmem:[%s6170_s6] sm:$0xf] }
 0x142   :  { %2185 = vmatpush.bf16.msra.mxu3 %v2956_v22  ;;  %2211 = vmatpush.bf16.msrb.mxu1 %v3404_v23  ;;  %v3916_v22 = vld [vmem:[%s6171_s7 + $0x3c] sm:$0xf]  ;;  %v2957_v23 = vld [vmem:[%s6171_s7 + $0x54] sm:$0xf0]  ;;  %v315_v14 = vperm.slane %v5138_v12, 0 }
 0x143   :  { %v2960_v25 = vor.u32 %v3916_v22, %v2957_v23  ;;  %v3962_v22 = vld [vmem:[%s6171_s7 + $0x1a8] sm:$0xf0] }
 0x144   :  { %2197 = vmatpush.bf16.msrb.mxu0 %v3208_v26  ;;  %2223 = vmatpush.bf16.msrb.mxu2 %v3656_v29  ;;  %v3209_v26 = vld [vmem:[%s6171_s7 + $0x24c] sm:$0xf0] }
 0x145   :  { %v3212_v29 = vor.u32 %v3979_v24, %v3209_v26 }
 0x146   :  { %2186 = vmatpush.bf16.msra.mxu3 %v2928_v32  ;;  %2212 = vmatpush.bf16.msrb.mxu1 %v3376_v59  ;;  %v3769_v32 = vld [vmem:[%s6171_s7 + $0x6ac] sm:$0xf0]  ;;  %v3685_v59 = vld [vmem:[%s6171_s7 + $0x604] sm:$0xf0] }
 0x147   :  { %v3688_v60 = vor.u32 %v4098_v58, %v3685_v59  ;;  %v3019_v59 = vld [vmem:[%s6171_s7 + $0xb0] sm:$0xf] }
 0x148   :  { %2198 = vmatpush.bf16.msrb.mxu0 %v3180_v34  ;;  %2224 = vmatpush.bf16.msrb.mxu2 %v3628_v63  ;;  %v3909_v34 = vld [vmem:[%s6171_s7 + $0x4] sm:$0xf]  ;;  %v4091_v63 = vld [vmem:[%s6171_s7 + $0x5b4] sm:$0xf] }
 0x149   :  { %v2932_v37 = vor.u32 %v3909_v34, %v2929_v35  ;;  %v3660_v2 = vor.u32 %v4091_v63, %v3657_v1  ;;  %v3997_v63 = vld [vmem:[%s6171_s7 + $0x2c0] sm:$0xf0]  ;;  %v4074_v1 = vld [vmem:[%s6171_s7 + $0x528] sm:$0xf0] }
 0x14a   :  { %2231 = vmatpush.bf16.msrb.mxu3 %v3128_v33  ;;  %2257 = vmatpush.bf16.msra.mxu1 %v3576_v8  ;;  %v3772_v33 = vor.u32 %v4119_v31, %v3769_v32  ;;  %v3632_v8 = vor.u32 %v4084_v5, %v3629_v7  ;;  %v3355_v31 = vld [vmem:[%s6171_s7 + $0x350] sm:$0xf]  ;;  %v4018_v32 = vld [vmem:[%s6171_s7 + $0x368] sm:$0xf0]  ;;  %v2991_v7 = vld [vmem:[%s6171_s7 + $0x78] sm:$0xf] }
 0x14c   :  { %2199 = vmatpush.bf16.msrb.mxu0 %v3152_v42  ;;  %2225 = vmatpush.bf16.msrb.mxu2 %v3600_v9  ;;  %v3492_v42 = vor.u32 %v4049_v39, %v3489_v40  ;;  %v3075_v39 = vld [vmem:[%s6171_s7 + $0x120] sm:$0xf] }
 0x14e   :  { %2232 = vmatpush.bf16.msrb.mxu3 %v3100_v41  ;;  %2258 = vmatpush.bf16.msra.mxu1 %v3548_v18  ;;  %v3184_v41 = vor.u32 %v3972_v36, %v3181_v38  ;;  %v3356_v38 = vor.u32 %v4018_v32, %v3355_v31  ;;  %v3523_v31 = vld [vmem:[%s6171_s7 + $0x4a0] sm:$0xf]  ;;  %v4060_v32 = vld [vmem:[%s6171_s7 + $0x4b8] sm:$0xf0] }
 0x150   :  { %2244 = vmatpush.bf16.msra.mxu0 %v3352_v45  ;;  %2270 = vmatpush.bf16.msra.mxu2 %v3800_v21  ;;  %v3744_v45 = vor.u32 %v4112_v43, %v3741_v44  ;;  %v3131_v21 = vld [vmem:[%s6171_s7 + $0x190] sm:$0xf]  ;;  %v4011_v43 = vld [vmem:[%s6171_s7 + $0x330] sm:$0xf0]  ;;  %v317_v44 = vperm.slane %v5138_v12, 2 }
 0x151   :  { %v3132_v26 = vor.u32 %v3962_v22, %v3131_v21 }
 0x152   :  { %2233 = vmatpush.bf16.msrb.mxu3 %v3072_v48  ;;  %2259 = vmatpush.bf16.msra.mxu1 %v3520_v30  ;;  %v3156_v48 = vor.u32 %v3965_v46, %v3153_v47  ;;  %v3955_v30 = vld [vmem:[%s6171_s7 + $0x170] sm:$0xf0] }
 0x154   :  { %2245 = vmatpush.bf16.msra.mxu0 %v3324_v51  ;;  %2271 = vmatpush.bf16.msra.mxu2 %v3772_v33  ;;  %v4105_v51 = vld [vmem:[%s6171_s7 + $0x624] sm:$0xf] }
 0x156   :  { %2234 = vmatpush.bf16.msrb.mxu3 %v3044_v54  ;;  %2260 = vmatpush.bf16.msra.mxu1 %v3492_v42  ;;  %v3716_v54 = vor.u32 %v4105_v51, %v3713_v53  ;;  %v3327_v42 = vld [vmem:[%s6171_s7 + $0x318] sm:$0xf]  ;;  %v4004_v51 = vld [vmem:[%s6171_s7 + $0x2f8] sm:$0xf0] }
 0x157   :  { %v3328_v47 = vor.u32 %v4011_v43, %v3327_v42  ;;  %v3300_v58 = vor.u32 %v4004_v51, %v3299_v50  ;;  %v3187_v43 = vld [vmem:[%s6171_s7 + $0x200] sm:$0xf]  ;;  %v3133_v50 = vld [vmem:[%s6171_s7 + $0x1ac] sm:$0xf0] }
 0x158   :  { %2246 = vmatpush.bf16.msra.mxu0 %v3296_v55  ;;  %2272 = vmatpush.bf16.msra.mxu2 %v3744_v45  ;;  %v4035_v55 = vld [vmem:[%s6171_s7 + $0x3f4] sm:$0xf] }
 0x159   :  { %v3436_v57 = vor.u32 %v4035_v55, %v3433_v56 }
 0x15a   :  { %2235 = vmatpush.bf16.msrb.mxu3 %v3016_v0  ;;  %2261 = vmatpush.bf16.msra.mxu1 %v3464_v52  ;;  %v3408_v0 = vor.u32 %v4028_v61, %v3405_v62  ;;  %v3934_v61 = vld [vmem:[%s6171_s7 + $0xc8] sm:$0xf0]  ;;  %v3271_v62 = vld [vmem:[%s6171_s7 + $0x2a8] sm:$0xf] }
 0x15b   :  { %v3020_v5 = vor.u32 %v3934_v61, %v3019_v59  ;;  %v4109_v61 = vld [vmem:[%s6171_s7 + $0x640] sm:$0xf0] }
 0x15c   :  { %2247 = vmatpush.bf16.msra.mxu0 %v3268_v4  ;;  %2273 = vmatpush.bf16.msra.mxu2 %v3716_v54  ;;  %v3377_v4 = vld [vmem:[%s6171_s7 + $0x39c] sm:$0xf0]  ;;  %v318_v54 = vperm.slane %v5138_v12, 3 }
 0x15d   :  { %v3380_v6 = vor.u32 %v4021_v3, %v3377_v4 }
 0x15e   :  { %2236 = vmatpush.bf16.msrb.mxu3 %v2988_v13  ;;  %2262 = vmatpush.bf16.msra.mxu1 %v3436_v57  ;;  %v3604_v13 = vor.u32 %v4077_v10, %v3601_v11 }
 0x160   :  { %2248 = vmatpush.bf16.msra.mxu0 %v3240_v17  ;;  %2274 = vmatpush.bf16.msra.mxu2 %v3688_v60  ;;  %v316_v17 = vperm.slane %v5138_v12, 1  ;;  %v3243_v12 = vld [vmem:[%s6171_s7 + $0x270] sm:$0xf] }
 0x162   :  { %2237 = vmatpush.bf16.msrb.mxu3 %v2960_v25  ;;  %2263 = vmatpush.bf16.msra.mxu1 %v3408_v0  ;;  %v3579_v0 = vld [vmem:[%s6171_s7 + $0x510] sm:$0xf] }
 0x163   :  { %v3580_v11 = vor.u32 %v4074_v1, %v3579_v0  ;;  %v4015_v0 = vld [vmem:[%s6171_s7 + $0x354] sm:$0xf]  ;;  %v3357_v1 = vld [vmem:[%s6171_s7 + $0x36c] sm:$0xf0] }
 0x164   :  { %2249 = vmatpush.bf16.msra.mxu0 %v3212_v29  ;;  %2275 = vmatpush.bf16.msra.mxu2 %v3660_v2 }
 0x166   :  { %2238 = vmatpush.bf16.msrb.mxu3 %v2932_v37  ;;  %2264 = vmatpush.bf16.msra.mxu1 %v3380_v6  ;;  %v3104_v37 = vor.u32 %v3955_v30, %v3103_v27  ;;  %v3272_v6 = vor.u32 %v3997_v63, %v3271_v62  ;;  %v3983_v30 = vld [vmem:[%s6171_s7 + $0x250] sm:$0xf0]  ;;  %v3952_v62 = vld [vmem:[%s6171_s7 + $0x15c] sm:$0xf]  ;;  %v3105_v63 = vld [vmem:[%s6171_s7 + $0x174] sm:$0xf0] }
 0x168   :  { %2250 = vmatpush.bf16.msra.mxu0 %v3184_v41  ;;  %2276 = vmatpush.bf16.msra.mxu2 %v3632_v8  ;;  %v3948_v41 = vld [vmem:[%s6171_s7 + $0x138] sm:$0xf0]  ;;  %v3927_v8 = vld [vmem:[%s6171_s7 + $0x90] sm:$0xf0] }
 0x169   :  { %v3076_v46 = vor.u32 %v3948_v41, %v3075_v39  ;;  %v2992_v21 = vor.u32 %v3927_v8, %v2991_v7  ;;  %v3913_v39 = vld [vmem:[%s6171_s7 + $0x20] sm:$0xf0]  ;;  %v3524_v41 = vor.u32 %v4060_v32, %v3523_v31  ;;  %v3108_v7 = vor.u32 %v3952_v62, %v3105_v63  ;;  %v3383_v32 = vld [vmem:[%s6171_s7 + $0x388] sm:$0xf] }
 0x16a   :  { %v3360_v8 = vor.u32 %v4015_v0, %v3357_v1  ;;  %v3917_v63 = vld [vmem:[%s6171_s7 + $0x44] sm:$0xf]  ;;  %v2965_v0 = vld [vmem:[%s6171_s7 + $0x5c] sm:$0xf0] }
 0x16c   :  { %2251 = vmatpush.bf16.msra.mxu0 %v3156_v48  ;;  %2277 = vmatpush.bf16.msra.mxu2 %v3604_v13  ;;  %v3047_v48 = vld [vmem:[%s6171_s7 + $0xe8] sm:$0xf]  ;;  %v3990_v13 = vld [vmem:[%s6171_s7 + $0x288] sm:$0xf0] }
 0x16d   :  { %v3048_v57 = vor.u32 %v3941_v49, %v3047_v48  ;;  %v3244_v22 = vor.u32 %v3990_v13, %v3243_v12  ;;  %v4116_v48 = vld [vmem:[%s6171_s7 + $0x678] sm:$0xf0]  ;;  %v3959_v49 = vld [vmem:[%s6171_s7 + $0x194] sm:$0xf]  ;;  %v3945_v12 = vld [vmem:[%s6171_s7 + $0x124] sm:$0xf] }
 0x16e   :  { %v3136_v59 = vor.u32 %v3959_v49, %v3133_v50  ;;  %v3077_v13 = vld [vmem:[%s6171_s7 + $0x13c] sm:$0xf0]  ;;  %v4081_v50 = vld [vmem:[%s6171_s7 + $0x560] sm:$0xf0] }
 0x1a6   :  { %v678_v9 = vpop.f32.mrf.mxu1 }
 0x1a7   :  { %v679_v23 = vadd.f32 %v678_v9, %v316_v17  ;;  %v4067_v17 = vld [vmem:[%s6171_s7 + $0x4f0] sm:$0xf0] }
 0x1ac   :  { %v652_v15 = vpop.f32.mrf.mxu3  ;;  %v665_v16 = vpop.f32.mrf.mxu0 }
 0x1ad   :  { %v653_v18 = vadd.f32 %v652_v15, %v315_v14  ;;  %v3551_v14 = vld [vmem:[%s6171_s7 + $0x4d8] sm:$0xf] }
 0x1ae   :  { %v680_v19 = vpop.f32.mrf.mxu1 }
 0x1af   :  { %v666_v20 = vadd.f32 %v665_v16, %v653_v18  ;;  %v3803_v18 = vld [vmem:[%s6171_s7 + $0x6d0] sm:$0xf]  ;;  %v4130_v19 = vld [vmem:[%s6171_s7 + $0x6e8] sm:$0xf0] }
 0x1b0   :  { %v3804_v27 = vor.u32 %v4130_v19, %v3803_v18  ;;  %v3411_v18 = vld [vmem:[%s6171_s7 + $0x3c0] sm:$0xf]  ;;  %v4032_v19 = vld [vmem:[%s6171_s7 + $0x3d8] sm:$0xf0] }
 0x1b1   :  { %v747_v24 = vmax.f32 %v666_v20, 0.0 }
 0x1b2   :  { %v691_v25 = vpop.f32.mrf.mxu2 }
 0x1b3   :  { %v5151_v28 = vpack.c.bf16 %v747_v24, %v747_v24  ;;  %v692_v29 = vadd.f32 %v691_v25, %v679_v23  ;;  %v2963_v23 = vld [vmem:[%s6171_s7 + $0x40] sm:$0xf]  ;;  %v3920_v24 = vld [vmem:[%s6171_s7 + $0x58] sm:$0xf0] }
 0x1b4   :  { %v654_v33 = vpop.f32.mrf.mxu3  ;;  %v667_v34 = vpop.f32.mrf.mxu0 }
 0x1b5   :  { %v748_v35 = vmax.f32 %v692_v29, 0.0  ;;  %2187 = vmatmul.bf16.vlgmr.msra.gmra.mxu3 %v5151_v28  ;;  %v3215_v29 = vld [vmem:[%s6171_s7 + $0x238] sm:$0xf]  ;;  %v4123_v34 = vld [vmem:[%s6171_s7 + $0x6b0] sm:$0xf0] }
 0x1b6   :  { %2283 = vmatpush.bf16.msra.mxu3 %v3132_v26  ;;  %v730_v36 = vpop.f32.mrf.mxu1  ;;  %v3552_v26 = vor.u32 %v4067_v17, %v3551_v14  ;;  %v3775_v33 = vld [vmem:[%s6171_s7 + $0x698] sm:$0xf]  ;;  %v4008_v14 = vld [vmem:[%s6171_s7 + $0x31c] sm:$0xf] }
 0x1b7   :  { %v5166_v40 = vpack.c.bf16 %v748_v35, %v748_v35  ;;  %v731_v2 = vadd.f32 %v730_v36, %v318_v54  ;;  %v2964_v36 = vor.u32 %v3920_v24, %v2963_v23  ;;  %v3776_v42 = vor.u32 %v4123_v34, %v3775_v33  ;;  %v4095_v23 = vld [vmem:[%s6171_s7 + $0x5d0] sm:$0xf0]  ;;  %v3938_v24 = vld [vmem:[%s6171_s7 + $0xec] sm:$0xf]  ;;  %v4025_v33 = vld [vmem:[%s6171_s7 + $0x3a0] sm:$0xf0] }
 0x1b9   :  { %2200 = vmatmul.bf16.vlgmr.msrb.gmra.mxu0 %v5166_v40 }
 0x1ba   :  { %2284 = vmatpush.bf16.msra.mxu3 %v3104_v37  ;;  %2296 = vmatpush.bf16.msrb.mxu0 %v3356_v38  ;;  %v693_v45 = vpop.f32.mrf.mxu2  ;;  %v3216_v37 = vor.u32 %v3983_v30, %v3215_v29  ;;  %v2935_v38 = vld [vmem:[%s6171_s7 + $0x8] sm:$0xf]  ;;  %v3301_v29 = vld [vmem:[%s6171_s7 + $0x2fc] sm:$0xf0]  ;;  %v3412_v30 = vor.u32 %v4032_v19, %v3411_v18  ;;  %v4050_v18 = vld [vmem:[%s6171_s7 + $0x46c] sm:$0xf] }
 0x1bb   :  { %v3495_v45 = vld [vmem:[%s6171_s7 + $0x468] sm:$0xf]  ;;  %v2936_v51 = vor.u32 %v3913_v39, %v2935_v38  ;;  %v3931_v38 = vld [vmem:[%s6171_s7 + $0xb4] sm:$0xf]  ;;  %v3021_v39 = vld [vmem:[%s6171_s7 + $0xcc] sm:$0xf0] }
 0x1bc   :  { %v704_v52 = vpop.f32.mrf.mxu3  ;;  %v717_v53 = vpop.f32.mrf.mxu0  ;;  %v3497_v19 = vld [vmem:[%s6171_s7 + $0x484] sm:$0xf0] }
 0x1bd   :  { %v705_v55 = vadd.f32 %v704_v52, %v317_v44  ;;  %v3976_v44 = vld [vmem:[%s6171_s7 + $0x218] sm:$0xf0] }
 0x1be   :  { %2285 = vmatpush.bf16.msra.mxu3 %v3076_v46  ;;  %2297 = vmatpush.bf16.msrb.mxu0 %v3328_v47  ;;  %v732_v56 = vpop.f32.mrf.mxu1  ;;  %v4053_v46 = vld [vmem:[%s6171_s7 + $0x480] sm:$0xf0]  ;;  %v3747_v47 = vld [vmem:[%s6171_s7 + $0x660] sm:$0xf]  ;;  %v3188_v52 = vor.u32 %v3976_v44, %v3187_v43  ;;  %v4071_v43 = vld [vmem:[%s6171_s7 + $0x514] sm:$0xf] }
 0x1bf   :  { %v718_v60 = vadd.f32 %v717_v53, %v705_v55  ;;  %v3159_v53 = vld [vmem:[%s6171_s7 + $0x1c8] sm:$0xf]  ;;  %v3496_v54 = vor.u32 %v4053_v46, %v3495_v45  ;;  %v3748_v55 = vor.u32 %v4116_v48, %v3747_v47  ;;  %v3969_v56 = vld [vmem:[%s6171_s7 + $0x1e0] sm:$0xf0]  ;;  %v3581_v44 = vld [vmem:[%s6171_s7 + $0x52c] sm:$0xf0]  ;;  %v3384_v45 = vor.u32 %v4025_v33, %v3383_v32 }
 0x1c0   :  { %v3607_v47 = vld [vmem:[%s6171_s7 + $0x548] sm:$0xf]  ;;  %v3024_v48 = vor.u32 %v3931_v38, %v3021_v39  ;;  %v4043_v32 = vld [vmem:[%s6171_s7 + $0x434] sm:$0xf]  ;;  %v3469_v33 = vld [vmem:[%s6171_s7 + $0x44c] sm:$0xf0] }
 0x1c1   :  { %v749_v3 = vmax.f32 %v718_v60, 0.0  ;;  %v3719_v60 = vld [vmem:[%s6171_s7 + $0x628] sm:$0xf]  ;;  %v3956_v38 = vld [vmem:[%s6171_s7 + $0x178] sm:$0xf0] }
 0x1c2   :  { %2286 = vmatpush.bf16.msra.mxu3 %v3048_v57  ;;  %2298 = vmatpush.bf16.msrb.mxu0 %v3300_v58  ;;  %v743_v4 = vpop.f32.mrf.mxu2  ;;  %v3467_v57 = vld [vmem:[%s6171_s7 + $0x430] sm:$0xf]  ;;  %v4046_v58 = vld [vmem:[%s6171_s7 + $0x448] sm:$0xf0]  ;;  %v3363_v39 = vld [vmem:[%s6171_s7 + $0x358] sm:$0xf] }
 0x1c3   :  { %v5216_v9 = vpack.c.bf16 %v749_v3, %v749_v3  ;;  %v744_v10 = vadd.f32 %v743_v4, %v731_v2  ;;  %v3160_v2 = vor.u32 %v3969_v56, %v3159_v53  ;;  %v3468_v3 = vor.u32 %v4046_v58, %v3467_v57  ;;  %v4064_v56 = vld [vmem:[%s6171_s7 + $0x4dc] sm:$0xf]  ;;  %v3553_v57 = vld [vmem:[%s6171_s7 + $0x4f4] sm:$0xf0]  ;;  %v4127_v58 = vld [vmem:[%s6171_s7 + $0x6d4] sm:$0xf] }
 0x1c4   :  { %v706_v15 = vpop.f32.mrf.mxu3  ;;  %v719_v16 = vpop.f32.mrf.mxu0  ;;  %v3720_v4 = vor.u32 %v4109_v61, %v3719_v60  ;;  %v3584_v53 = vor.u32 %v4071_v43, %v3581_v44  ;;  %v3608_v60 = vor.u32 %v4081_v50, %v3607_v47  ;;  %v3556_v1 = vor.u32 %v4064_v56, %v3553_v57  ;;  %v3693_v50 = vld [vmem:[%s6171_s7 + $0x60c] sm:$0xf0]  ;;  %v4029_v57 = vld [vmem:[%s6171_s7 + $0x3c4] sm:$0xf] }
 0x1c5   :  { %v750_v20 = vmax.f32 %v744_v10, 0.0  ;;  %2213 = vmatmul.bf16.vlgmr.msrb.gmra.mxu1 %v5216_v9  ;;  %2239 = vmatmul.bf16.vlgmr.msrb.gmra.mxu3 %v5151_v28  ;;  %v3691_v10 = vld [vmem:[%s6171_s7 + $0x5f0] sm:$0xf]  ;;  %v3329_v15 = vld [vmem:[%s6171_s7 + $0x334] sm:$0xf0]  ;;  %v3472_v43 = vor.u32 %v4043_v32, %v3469_v33 }
 0x1c6   :  { %2287 = vmatpush.bf16.msra.mxu3 %v3020_v5  ;;  %2299 = vmatpush.bf16.msrb.mxu0 %v3272_v6  ;;  %v3439_v5 = vld [vmem:[%s6171_s7 + $0x3f8] sm:$0xf]  ;;  %v4039_v6 = vld [vmem:[%s6171_s7 + $0x410] sm:$0xf0]  ;;  %v4068_v32 = vld [vmem:[%s6171_s7 + $0x4f8] sm:$0xf0] }
 0x1c7   :  { %v5244_v25 = vpack.c.bf16 %v750_v20, %v750_v20  ;;  %2309 = vmatpush.bf16.msrb.mxu1 %v3580_v11  ;;  %v4102_v11 = vld [vmem:[%s6171_s7 + $0x608] sm:$0xf0]  ;;  %v3440_v16 = vor.u32 %v4039_v6, %v3439_v5  ;;  %v3080_v20 = vor.u32 %v3945_v12, %v3077_v13  ;;  %v4057_v5 = vld [vmem:[%s6171_s7 + $0x4a4] sm:$0xf]  ;;  %v3525_v6 = vld [vmem:[%s6171_s7 + $0x4bc] sm:$0xf0] }
 0x1c8   :  { %v3692_v17 = vor.u32 %v4102_v11, %v3691_v10  ;;  %v2968_v10 = vor.u32 %v3917_v63, %v2965_v0  ;;  %v3910_v12 = vld [vmem:[%s6171_s7 + $0xc] sm:$0xf]  ;;  %v2937_v13 = vld [vmem:[%s6171_s7 + $0x24] sm:$0xf0]  ;;  %v3055_v63 = vld [vmem:[%s6171_s7 + $0xf0] sm:$0xf] }
 0x1c9   :  { %2226 = vmatmul.bf16.vlgmr.msrb.gmra.mxu2 %v5244_v25  ;;  %2252 = vmatmul.bf16.vlgmr.msra.gmra.mxu0 %v5166_v40  ;;  %v3942_v0 = vld [vmem:[%s6171_s7 + $0x108] sm:$0xf0]  ;;  %v3811_v33 = vld [vmem:[%s6171_s7 + $0x6d8] sm:$0xf] }
 0x1ca   :  { %2288 = vmatpush.bf16.msra.mxu3 %v2992_v21  ;;  %2300 = vmatpush.bf16.msrb.mxu0 %v3244_v22  ;;  %v745_v35 = vpop.f32.mrf.mxu2  ;;  %v3332_v21 = vor.u32 %v4008_v14, %v3329_v15  ;;  %v3663_v22 = vld [vmem:[%s6171_s7 + $0x5b8] sm:$0xf]  ;;  %v3528_v14 = vor.u32 %v4057_v5, %v3525_v6  ;;  %v4022_v5 = vld [vmem:[%s6171_s7 + $0x38c] sm:$0xf]  ;;  %v3385_v6 = vld [vmem:[%s6171_s7 + $0x3a4] sm:$0xf0] }
 0x1cb   :  { %2310 = vmatpush.bf16.msrb.mxu1 %v3552_v26  ;;  %2322 = vmatpush.bf16.msrb.mxu2 %v3804_v27  ;;  %v3049_v26 = vld [vmem:[%s6171_s7 + $0x104] sm:$0xf0]  ;;  %v4001_v27 = vld [vmem:[%s6171_s7 + $0x2e4] sm:$0xf]  ;;  %v3664_v31 = vor.u32 %v4095_v23, %v3663_v22  ;;  %v3139_v22 = vld [vmem:[%s6171_s7 + $0x198] sm:$0xf] }
 0x1cc   :  { %v3052_v34 = vor.u32 %v3938_v24, %v3049_v26  ;;  %v3304_v35 = vor.u32 %v4001_v27, %v3301_v29  ;;  %v3963_v23 = vld [vmem:[%s6171_s7 + $0x1b0] sm:$0xf0]  ;;  %v2940_v24 = vor.u32 %v3910_v12, %v2937_v13  ;;  %v3966_v27 = vld [vmem:[%s6171_s7 + $0x1cc] sm:$0xf]  ;;  %v3500_v29 = vor.u32 %v4050_v18, %v3497_v19  ;;  %v3027_v12 = vld [vmem:[%s6171_s7 + $0xb8] sm:$0xf] }
 0x1cd   :  { %v3935_v13 = vld [vmem:[%s6171_s7 + $0xd0] sm:$0xf0]  ;;  %v3388_v18 = vor.u32 %v4022_v5, %v3385_v6  ;;  %v3475_v5 = vld [vmem:[%s6171_s7 + $0x438] sm:$0xf] }
 0x1ce   :  { %2289 = vmatpush.bf16.msra.mxu3 %v2964_v36  ;;  %2301 = vmatpush.bf16.msrb.mxu0 %v3216_v37  ;;  %v3635_v36 = vld [vmem:[%s6171_s7 + $0x580] sm:$0xf]  ;;  %v4088_v37 = vld [vmem:[%s6171_s7 + $0x598] sm:$0xf0]  ;;  %v4047_v6 = vld [vmem:[%s6171_s7 + $0x450] sm:$0xf0] }
 0x1cf   :  { %2311 = vmatpush.bf16.msrb.mxu1 %v3524_v41  ;;  %2323 = vmatpush.bf16.msrb.mxu2 %v3776_v42  ;;  %v3994_v41 = vld [vmem:[%s6171_s7 + $0x2ac] sm:$0xf]  ;;  %v3273_v42 = vld [vmem:[%s6171_s7 + $0x2c4] sm:$0xf0]  ;;  %v3636_v46 = vor.u32 %v4088_v37, %v3635_v36  ;;  %v3111_v37 = vld [vmem:[%s6171_s7 + $0x160] sm:$0xf] }
 0x1d0   :  { %v3276_v49 = vor.u32 %v3994_v41, %v3273_v42  ;;  %v3721_v36 = vld [vmem:[%s6171_s7 + $0x644] sm:$0xf0]  ;;  %v4019_v41 = vld [vmem:[%s6171_s7 + $0x370] sm:$0xf0]  ;;  %v3112_v47 = vor.u32 %v3956_v38, %v3111_v37 }
 0x1d1   :  { %v2971_v38 = vld [vmem:[%s6171_s7 + $0x48] sm:$0xf] }
 0x1d2   :  { %2290 = vmatpush.bf16.msra.mxu3 %v2936_v51  ;;  %2302 = vmatpush.bf16.msrb.mxu0 %v3188_v52  ;;  %v3924_v51 = vld [vmem:[%s6171_s7 + $0x7c] sm:$0xf]  ;;  %v2993_v52 = vld [vmem:[%s6171_s7 + $0x94] sm:$0xf0] }
 0x1d3   :  { %2312 = vmatpush.bf16.msrb.mxu1 %v3496_v54  ;;  %2324 = vmatpush.bf16.msrb.mxu2 %v3748_v55  ;;  %v3987_v54 = vld [vmem:[%s6171_s7 + $0x274] sm:$0xf]  ;;  %v3245_v55 = vld [vmem:[%s6171_s7 + $0x28c] sm:$0xf0]  ;;  %v2996_v61 = vor.u32 %v3924_v51, %v2993_v52  ;;  %v3083_v51 = vld [vmem:[%s6171_s7 + $0x128] sm:$0xf] }
 0x1d4   :  { %v3248_v62 = vor.u32 %v3987_v54, %v3245_v55  ;;  %v3949_v52 = vld [vmem:[%s6171_s7 + $0x140] sm:$0xf0]  ;;  %v4012_v54 = vld [vmem:[%s6171_s7 + $0x338] sm:$0xf0] }
 0x1d5   :  { %2265 = vmatmul.bf16.vlgmr.msra.gmra.mxu1 %v5216_v9  ;;  %2291 = vmatmul.bf16.vlgmr.msra.gmra.mxu3 %v5151_v28 }
 0x1d6   :  { %2335 = vmatpush.bf16.msrb.mxu3 %v3136_v59  ;;  %2303 = vmatpush.bf16.msrb.mxu0 %v3160_v2  ;;  %v3805_v59 = vld [vmem:[%s6171_s7 + $0x6ec] sm:$0xf0] }
 0x1d7   :  { %2313 = vmatpush.bf16.msrb.mxu1 %v3468_v3  ;;  %2325 = vmatpush.bf16.msrb.mxu2 %v3720_v4  ;;  %v3808_v2 = vor.u32 %v4127_v58, %v3805_v59  ;;  %v3980_v3 = vld [vmem:[%s6171_s7 + $0x23c] sm:$0xf]  ;;  %v3217_v4 = vld [vmem:[%s6171_s7 + $0x254] sm:$0xf0]  ;;  %v3413_v58 = vld [vmem:[%s6171_s7 + $0x3dc] sm:$0xf0]  ;;  %v3084_v59 = vor.u32 %v3949_v52, %v3083_v51 }
 0x1d8   :  { %v3220_v11 = vor.u32 %v3980_v3, %v3217_v4  ;;  %v3416_v3 = vor.u32 %v4029_v57, %v3413_v58  ;;  %v2943_v51 = vld [vmem:[%s6171_s7 + $0x10] sm:$0xf]  ;;  %v3914_v52 = vld [vmem:[%s6171_s7 + $0x28] sm:$0xf0] }
 0x1d9   :  { %2278 = vmatmul.bf16.vlgmr.msra.gmra.mxu2 %v5244_v25  ;;  %2304 = vmatmul.bf16.vlgmr.msrb.gmra.mxu0 %v5166_v40  ;;  %v3503_v57 = vld [vmem:[%s6171_s7 + $0x470] sm:$0xf]  ;;  %v4054_v58 = vld [vmem:[%s6171_s7 + $0x488] sm:$0xf0] }
 0x1da   :  { %2336 = vmatpush.bf16.msrb.mxu3 %v3108_v7  ;;  %2348 = vmatpush.bf16.msra.mxu0 %v3360_v8  ;;  %v4120_v7 = vld [vmem:[%s6171_s7 + $0x69c] sm:$0xf]  ;;  %v3777_v8 = vld [vmem:[%s6171_s7 + $0x6b4] sm:$0xf0] }
 0x1db   :  { %2314 = vmatpush.bf16.msrb.mxu1 %v3440_v16  ;;  %2326 = vmatpush.bf16.msrb.mxu2 %v3692_v17  ;;  %v3780_v15 = vor.u32 %v4120_v7, %v3777_v8  ;;  %v3973_v16 = vld [vmem:[%s6171_s7 + $0x204] sm:$0xf]  ;;  %v3189_v17 = vld [vmem:[%s6171_s7 + $0x21c] sm:$0xf0]  ;;  %v3056_v7 = vor.u32 %v3942_v0, %v3055_v63  ;;  %v2944_v63 = vor.u32 %v3914_v52, %v2943_v51  ;;  %v3932_v51 = vld [vmem:[%s6171_s7 + $0xbc] sm:$0xf] }
 0x1dc   :  { %v3192_v26 = vor.u32 %v3973_v16, %v3189_v17  ;;  %v3587_v16 = vld [vmem:[%s6171_s7 + $0x518] sm:$0xf]  ;;  %v4075_v17 = vld [vmem:[%s6171_s7 + $0x530] sm:$0xf0] }
 0x1dd   :  { %v3029_v52 = vld [vmem:[%s6171_s7 + $0xd4] sm:$0xf0] }
 0x1de   :  { %2337 = vmatpush.bf16.msrb.mxu3 %v3080_v20  ;;  %2349 = vmatpush.bf16.msra.mxu0 %v3332_v21  ;;  %v4113_v20 = vld [vmem:[%s6171_s7 + $0x664] sm:$0xf]  ;;  %v3749_v21 = vld [vmem:[%s6171_s7 + $0x67c] sm:$0xf0] }
 0x1df   :  { %2315 = vmatpush.bf16.msrb.mxu1 %v3412_v30  ;;  %2327 = vmatpush.bf16.msrb.mxu2 %v3664_v31  ;;  %v3752_v30 = vor.u32 %v4113_v20, %v3749_v21  ;;  %v3161_v31 = vld [vmem:[%s6171_s7 + $0x1e4] sm:$0xf0]  ;;  %v4078_v20 = vld [vmem:[%s6171_s7 + $0x54c] sm:$0xf]  ;;  %v3028_v21 = vor.u32 %v3935_v13, %v3027_v12  ;;  %v3113_v12 = vld [vmem:[%s6171_s7 + $0x17c] sm:$0xf0] }
 0x1e0   :  { %v3164_v42 = vor.u32 %v3966_v27, %v3161_v31  ;;  %v3588_v27 = vor.u32 %v4075_v17, %v3587_v16  ;;  %v3559_v31 = vld [vmem:[%s6171_s7 + $0x4e0] sm:$0xf]  ;;  %v4016_v13 = vld [vmem:[%s6171_s7 + $0x35c] sm:$0xf]  ;;  %v3476_v16 = vor.u32 %v4047_v6, %v3475_v5 }
 0x1e1   :  { %v3561_v5 = vld [vmem:[%s6171_s7 + $0x4fc] sm:$0xf0]  ;;  %v4128_v6 = vld [vmem:[%s6171_s7 + $0x6dc] sm:$0xf] }
 0x1e2   :  { %2338 = vmatpush.bf16.msrb.mxu3 %v3052_v34  ;;  %2350 = vmatpush.bf16.msra.mxu0 %v3304_v35  ;;  %v3140_v34 = vor.u32 %v3963_v23, %v3139_v22  ;;  %v4106_v35 = vld [vmem:[%s6171_s7 + $0x62c] sm:$0xf]  ;;  %v3609_v23 = vld [vmem:[%s6171_s7 + $0x564] sm:$0xf0] }
 0x1e3   :  { %2316 = vmatpush.bf16.msrb.mxu1 %v3384_v45  ;;  %2328 = vmatpush.bf16.msrb.mxu2 %v3636_v46  ;;  %v3724_v44 = vor.u32 %v4106_v35, %v3721_v36  ;;  %v4036_v45 = vld [vmem:[%s6171_s7 + $0x3fc] sm:$0xf]  ;;  %v3441_v46 = vld [vmem:[%s6171_s7 + $0x414] sm:$0xf0]  ;;  %v3612_v35 = vor.u32 %v4078_v20, %v3609_v23  ;;  %v4103_v23 = vld [vmem:[%s6171_s7 + $0x610] sm:$0xf0] }
 0x1e4   :  { %v3444_v55 = vor.u32 %v4036_v45, %v3441_v46  ;;  %v3531_v45 = vld [vmem:[%s6171_s7 + $0x4a8] sm:$0xf]  ;;  %v4061_v46 = vld [vmem:[%s6171_s7 + $0x4c0] sm:$0xf0] }
 0x1e6   :  { %2339 = vmatpush.bf16.msrb.mxu3 %v3024_v48  ;;  %2351 = vmatpush.bf16.msra.mxu0 %v3276_v49  ;;  %v3364_v48 = vor.u32 %v4019_v41, %v3363_v39  ;;  %v4099_v49 = vld [vmem:[%s6171_s7 + $0x5f4] sm:$0xf]  ;;  %v3921_v39 = vld [vmem:[%s6171_s7 + $0x60] sm:$0xf0]  ;;  %v3560_v41 = vor.u32 %v4068_v32, %v3559_v31  ;;  %v3419_v32 = vld [vmem:[%s6171_s7 + $0x3c8] sm:$0xf] }
 0x1e7   :  { %2361 = vmatpush.bf16.msra.mxu1 %v3584_v53  ;;  %2329 = vmatpush.bf16.msrb.mxu2 %v3608_v60  ;;  %v3335_v53 = vld [vmem:[%s6171_s7 + $0x320] sm:$0xf]  ;;  %v3696_v56 = vor.u32 %v4099_v49, %v3693_v50  ;;  %v2972_v49 = vor.u32 %v3921_v39, %v2971_v38  ;;  %v3939_v38 = vld [vmem:[%s6171_s7 + $0xf4] sm:$0xf]  ;;  %v3057_v39 = vld [vmem:[%s6171_s7 + $0x10c] sm:$0xf0] }
 0x1e8   :  { %2317 = vmatmul.bf16.vlgmr.msrb.gmra.mxu1 %v5216_v9  ;;  %v3336_v60 = vor.u32 %v4012_v54, %v3335_v53  ;;  %v3532_v53 = vor.u32 %v4061_v46, %v3531_v45  ;;  %v3391_v45 = vld [vmem:[%s6171_s7 + $0x390] sm:$0xf]  ;;  %v4026_v46 = vld [vmem:[%s6171_s7 + $0x3a8] sm:$0xf0] }
 0x1ea   :  { %2340 = vmatpush.bf16.msrb.mxu3 %v2996_v61  ;;  %2352 = vmatpush.bf16.msra.mxu0 %v3248_v62  ;;  %v4092_v61 = vld [vmem:[%s6171_s7 + $0x5bc] sm:$0xf]  ;;  %v3665_v62 = vld [vmem:[%s6171_s7 + $0x5d4] sm:$0xf0] }
 0x1eb   :  { %2362 = vmatpush.bf16.msra.mxu1 %v3556_v1  ;;  %2374 = vmatpush.bf16.msra.mxu2 %v3808_v2  ;;  %v3307_v1 = vld [vmem:[%s6171_s7 + $0x2e8] sm:$0xf]  ;;  %v4005_v2 = vld [vmem:[%s6171_s7 + $0x300] sm:$0xf0]  ;;  %v3668_v4 = vor.u32 %v4092_v61, %v3665_v62  ;;  %v3960_v61 = vld [vmem:[%s6171_s7 + $0x19c] sm:$0xf] }
 0x1ec   :  { %2330 = vmatmul.bf16.vlgmr.msrb.gmra.mxu2 %v5244_v25  ;;  %v3308_v8 = vor.u32 %v4005_v2, %v3307_v1  ;;  %v3141_v62 = vld [vmem:[%s6171_s7 + $0x1b4] sm:$0xf0]  ;;  %v3167_v1 = vld [vmem:[%s6171_s7 + $0x1d0] sm:$0xf]  ;;  %v3504_v2 = vor.u32 %v4054_v58, %v3503_v57  ;;  %v3392_v57 = vor.u32 %v4026_v46, %v3391_v45  ;;  %v4044_v45 = vld [vmem:[%s6171_s7 + $0x43c] sm:$0xf] }
 0x1ed   :  { %v3477_v46 = vld [vmem:[%s6171_s7 + $0x454] sm:$0xf0] }
 0x1ee   :  { %2341 = vmatpush.bf16.msrb.mxu3 %v2968_v10  ;;  %2353 = vmatpush.bf16.msra.mxu0 %v3220_v11  ;;  %v4085_v10 = vld [vmem:[%s6171_s7 + $0x584] sm:$0xf]  ;;  %v3637_v11 = vld [vmem:[%s6171_s7 + $0x59c] sm:$0xf0] }
 0x1ef   :  { %2363 = vmatpush.bf16.msra.mxu1 %v3528_v14  ;;  %2375 = vmatpush.bf16.msra.mxu2 %v3780_v15  ;;  %v3279_v14 = vld [vmem:[%s6171_s7 + $0x2b0] sm:$0xf]  ;;  %v3998_v15 = vld [vmem:[%s6171_s7 + $0x2c8] sm:$0xf0]  ;;  %v3640_v19 = vor.u32 %v4085_v10, %v3637_v11  ;;  %v3953_v11 = vld [vmem:[%s6171_s7 + $0x164] sm:$0xf] }
 0x1f0   :  { %v3280_v22 = vor.u32 %v3998_v15, %v3279_v14  ;;  %v4110_v10 = vld [vmem:[%s6171_s7 + $0x648] sm:$0xf0]  ;;  %v3365_v14 = vld [vmem:[%s6171_s7 + $0x374] sm:$0xf0]  ;;  %v3116_v20 = vor.u32 %v3953_v11, %v3113_v12 }
 0x1f1   :  { %v3918_v12 = vld [vmem:[%s6171_s7 + $0x4c] sm:$0xf] }
 0x1f2   :  { %2342 = vmatpush.bf16.msrb.mxu3 %v2940_v24  ;;  %2354 = vmatpush.bf16.msra.mxu0 %v3192_v26  ;;  %v2999_v24 = vld [vmem:[%s6171_s7 + $0x80] sm:$0xf]  ;;  %v3928_v26 = vld [vmem:[%s6171_s7 + $0x98] sm:$0xf0] }
 0x1f3   :  { %2364 = vmatpush.bf16.msra.mxu1 %v3500_v29  ;;  %2376 = vmatpush.bf16.msra.mxu2 %v3752_v30  ;;  %v3251_v29 = vld [vmem:[%s6171_s7 + $0x278] sm:$0xf]  ;;  %v3991_v30 = vld [vmem:[%s6171_s7 + $0x290] sm:$0xf0]  ;;  %v3000_v36 = vor.u32 %v3928_v26, %v2999_v24  ;;  %v3946_v24 = vld [vmem:[%s6171_s7 + $0x12c] sm:$0xf] }
 0x1f4   :  { %v3252_v37 = vor.u32 %v3991_v30, %v3251_v29  ;;  %v3085_v26 = vld [vmem:[%s6171_s7 + $0x144] sm:$0xf0]  ;;  %v3337_v29 = vld [vmem:[%s6171_s7 + $0x33c] sm:$0xf0] }
 0x1f5   :  { %2343 = vmatmul.bf16.vlgmr.msrb.gmra.mxu3 %v5151_v28 }
 0x1f6   :  { %2387 = vmatpush.bf16.msra.mxu3 %v3140_v34  ;;  %2355 = vmatpush.bf16.msra.mxu0 %v3164_v42  ;;  %v4131_v34 = vld [vmem:[%s6171_s7 + $0x6f0] sm:$0xf0] }
 0x1f7   :  { %2365 = vmatpush.bf16.msra.mxu1 %v3472_v43  ;;  %2377 = vmatpush.bf16.msra.mxu2 %v3724_v44  ;;  %v3812_v42 = vor.u32 %v4131_v34, %v3811_v33  ;;  %v3223_v43 = vld [vmem:[%s6171_s7 + $0x240] sm:$0xf]  ;;  %v3984_v44 = vld [vmem:[%s6171_s7 + $0x258] sm:$0xf0]  ;;  %v4033_v33 = vld [vmem:[%s6171_s7 + $0x3e0] sm:$0xf0]  ;;  %v3088_v34 = vor.u32 %v3946_v24, %v3085_v26 }
 0x1f8   :  { %v3224_v50 = vor.u32 %v3984_v44, %v3223_v43  ;;  %v3420_v43 = vor.u32 %v4033_v33, %v3419_v32  ;;  %v3911_v24 = vld [vmem:[%s6171_s7 + $0x14] sm:$0xf]  ;;  %v2945_v26 = vld [vmem:[%s6171_s7 + $0x2c] sm:$0xf0] }
 0x1f9   :  { %2356 = vmatmul.bf16.vlgmr.msra.gmra.mxu0 %v5166_v40  ;;  %v4051_v32 = vld [vmem:[%s6171_s7 + $0x474] sm:$0xf]  ;;  %v3505_v33 = vld [vmem:[%s6171_s7 + $0x48c] sm:$0xf0] }
 0x1fa   :  { %2388 = vmatpush.bf16.msra.mxu3 %v3112_v47  ;;  %2400 = vmatpush.bf16.msrb.mxu0 %v3364_v48  ;;  %v3783_v47 = vld [vmem:[%s6171_s7 + $0x6a0] sm:$0xf]  ;;  %v4124_v48 = vld [vmem:[%s6171_s7 + $0x6b8] sm:$0xf0] }
 0x1fb   :  { %2366 = vmatpush.bf16.msra.mxu1 %v3444_v55  ;;  %2378 = vmatpush.bf16.msra.mxu2 %v3696_v56  ;;  %v3784_v54 = vor.u32 %v4124_v48, %v3783_v47  ;;  %v3195_v55 = vld [vmem:[%s6171_s7 + $0x208] sm:$0xf]  ;;  %v3977_v56 = vld [vmem:[%s6171_s7 + $0x220] sm:$0xf0]  ;;  %v3060_v47 = vor.u32 %v3939_v38, %v3057_v39  ;;  %v2948_v38 = vor.u32 %v3911_v24, %v2945_v26  ;;  %v3035_v26 = vld [vmem:[%s6171_s7 + $0xc0] sm:$0xf] }
 0x1fc   :  { %v3196_v0 = vor.u32 %v3977_v56, %v3195_v55  ;;  %v4072_v55 = vld [vmem:[%s6171_s7 + $0x51c] sm:$0xf]  ;;  %v3589_v56 = vld [vmem:[%s6171_s7 + $0x534] sm:$0xf0]  ;;  %v3645_v24 = vld [vmem:[%s6171_s7 + $0x5a4] sm:$0xf0] }
 0x1fe   :  { %2389 = vmatpush.bf16.msra.mxu3 %v3084_v59  ;;  %2401 = vmatpush.bf16.msrb.mxu0 %v3336_v60  ;;  %v3755_v59 = vld [vmem:[%s6171_s7 + $0x668] sm:$0xf]  ;;  %v4117_v60 = vld [vmem:[%s6171_s7 + $0x680] sm:$0xf0] }
 0x1ff   :  { %2367 = vmatpush.bf16.msra.mxu1 %v3416_v3  ;;  %2379 = vmatpush.bf16.msra.mxu2 %v3668_v4  ;;  %v3756_v3 = vor.u32 %v4117_v60, %v3755_v59  ;;  %v3970_v4 = vld [vmem:[%s6171_s7 + $0x1e8] sm:$0xf0]  ;;  %v3615_v59 = vld [vmem:[%s6171_s7 + $0x550] sm:$0xf]  ;;  %v3032_v60 = vor.u32 %v3932_v51, %v3029_v52  ;;  %v3957_v51 = vld [vmem:[%s6171_s7 + $0x180] sm:$0xf0] }
 0x200   :  { %v3168_v15 = vor.u32 %v3970_v4, %v3167_v1  ;;  %v3592_v1 = vor.u32 %v4072_v55, %v3589_v56  ;;  %v4065_v4 = vld [vmem:[%s6171_s7 + $0x4e4] sm:$0xf]  ;;  %v3371_v52 = vld [vmem:[%s6171_s7 + $0x360] sm:$0xf]  ;;  %v3480_v55 = vor.u32 %v4044_v45, %v3477_v46  ;;  %v3992_v45 = vld [vmem:[%s6171_s7 + $0x298] sm:$0xf0] }
 0x201   :  { %v3567_v46 = vld [vmem:[%s6171_s7 + $0x4e8] sm:$0xf] }
 0x202   :  { %2390 = vmatpush.bf16.msra.mxu3 %v3056_v7  ;;  %2402 = vmatpush.bf16.msrb.mxu0 %v3308_v8  ;;  %v3144_v7 = vor.u32 %v3960_v61, %v3141_v62  ;;  %v3727_v8 = vld [vmem:[%s6171_s7 + $0x630] sm:$0xf]  ;;  %v4082_v62 = vld [vmem:[%s6171_s7 + $0x568] sm:$0xf0] }
 0x203   :  { %2368 = vmatpush.bf16.msra.mxu1 %v3388_v18  ;;  %2380 = vmatpush.bf16.msra.mxu2 %v3640_v19  ;;  %v3728_v17 = vor.u32 %v4110_v10, %v3727_v8  ;;  %v3447_v18 = vld [vmem:[%s6171_s7 + $0x400] sm:$0xf]  ;;  %v4040_v19 = vld [vmem:[%s6171_s7 + $0x418] sm:$0xf0]  ;;  %v3616_v8 = vor.u32 %v4082_v62, %v3615_v59  ;;  %v3701_v62 = vld [vmem:[%s6171_s7 + $0x614] sm:$0xf0] }
 0x204   :  { %v3448_v30 = vor.u32 %v4040_v19, %v3447_v18  ;;  %v4058_v18 = vld [vmem:[%s6171_s7 + $0x4ac] sm:$0xf]  ;;  %v3533_v19 = vld [vmem:[%s6171_s7 + $0x4c4] sm:$0xf0] }
 0x206   :  { %2391 = vmatpush.bf16.msra.mxu3 %v3028_v21  ;;  %2403 = vmatpush.bf16.msrb.mxu0 %v3280_v22  ;;  %v3368_v21 = vor.u32 %v4016_v13, %v3365_v14  ;;  %v3699_v22 = vld [vmem:[%s6171_s7 + $0x5f8] sm:$0xf]  ;;  %v2973_v13 = vld [vmem:[%s6171_s7 + $0x64] sm:$0xf0]  ;;  %v3564_v14 = vor.u32 %v4065_v4, %v3561_v5  ;;  %v4030_v5 = vld [vmem:[%s6171_s7 + $0x3cc] sm:$0xf] }
 0x207   :  { %2413 = vmatpush.bf16.msrb.mxu1 %v3588_v27  ;;  %2381 = vmatpush.bf16.msra.mxu2 %v3612_v35  ;;  %v4009_v27 = vld [vmem:[%s6171_s7 + $0x324] sm:$0xf]  ;;  %v3700_v31 = vor.u32 %v4103_v23, %v3699_v22  ;;  %v2976_v22 = vor.u32 %v3918_v12, %v2973_v13  ;;  %v3063_v12 = vld [vmem:[%s6171_s7 + $0xf8] sm:$0xf]  ;;  %v3943_v13 = vld [vmem:[%s6171_s7 + $0x110] sm:$0xf0] }
 0x208   :  { %2369 = vmatmul.bf16.vlgmr.msra.gmra.mxu1 %v5216_v9  ;;  %v3340_v35 = vor.u32 %v4009_v27, %v3337_v29  ;;  %v3536_v27 = vor.u32 %v4058_v18, %v3533_v19  ;;  %v4023_v18 = vld [vmem:[%s6171_s7 + $0x394] sm:$0xf]  ;;  %v3393_v19 = vld [vmem:[%s6171_s7 + $0x3ac] sm:$0xf0] }
 0x20a   :  { %2392 = vmatpush.bf16.msra.mxu3 %v3000_v36  ;;  %2404 = vmatpush.bf16.msrb.mxu0 %v3252_v37  ;;  %v3671_v36 = vld [vmem:[%s6171_s7 + $0x5c0] sm:$0xf]  ;;  %v4096_v37 = vld [vmem:[%s6171_s7 + $0x5d8] sm:$0xf0] }
 0x20b   :  { %2414 = vmatpush.bf16.msrb.mxu1 %v3560_v41  ;;  %2426 = vmatpush.bf16.msrb.mxu2 %v3812_v42  ;;  %v4002_v41 = vld [vmem:[%s6171_s7 + $0x2ec] sm:$0xf]  ;;  %v3309_v42 = vld [vmem:[%s6171_s7 + $0x304] sm:$0xf0]  ;;  %v3672_v44 = vor.u32 %v4096_v37, %v3671_v36  ;;  %v3147_v36 = vld [vmem:[%s6171_s7 + $0x1a0] sm:$0xf] }
 0x20c   :  { %2382 = vmatmul.bf16.vlgmr.msra.gmra.mxu2 %v5244_v25  ;;  %v3312_v48 = vor.u32 %v4002_v41, %v3309_v42  ;;  %v3964_v37 = vld [vmem:[%s6171_s7 + $0x1b8] sm:$0xf0]  ;;  %v3967_v41 = vld [vmem:[%s6171_s7 + $0x1d4] sm:$0xf]  ;;  %v3508_v42 = vor.u32 %v4051_v32, %v3505_v33  ;;  %v3595_v32 = vld [vmem:[%s6171_s7 + $0x520] sm:$0xf] }
 0x20d   :  { %v4076_v33 = vld [vmem:[%s6171_s7 + $0x538] sm:$0xf0] }
 0x20e   :  { %2393 = vmatpush.bf16.msra.mxu3 %v2972_v49  ;;  %2405 = vmatpush.bf16.msrb.mxu0 %v3224_v50  ;;  %v3643_v49 = vld [vmem:[%s6171_s7 + $0x588] sm:$0xf]  ;;  %v4089_v50 = vld [vmem:[%s6171_s7 + $0x5a0] sm:$0xf0] }
 0x20f   :  { %2415 = vmatpush.bf16.msrb.mxu1 %v3532_v53  ;;  %2427 = vmatpush.bf16.msrb.mxu2 %v3784_v54  ;;  %v3995_v53 = vld [vmem:[%s6171_s7 + $0x2b4] sm:$0xf]  ;;  %v3281_v54 = vld [vmem:[%s6171_s7 + $0x2cc] sm:$0xf0]  ;;  %v3644_v58 = vor.u32 %v4089_v50, %v3643_v49  ;;  %v3119_v50 = vld [vmem:[%s6171_s7 + $0x168] sm:$0xf] }
 0x210   :  { %v3284_v61 = vor.u32 %v3995_v53, %v3281_v54  ;;  %v3729_v49 = vld [vmem:[%s6171_s7 + $0x64c] sm:$0xf0]  ;;  %v4020_v53 = vld [vmem:[%s6171_s7 + $0x378] sm:$0xf0]  ;;  %v3120_v59 = vor.u32 %v3957_v51, %v3119_v50  ;;  %v6033_v51 = vld [vmem:[%s6172_s8] sm:$0xff] }
 0x212   :  { %2394 = vmatpush.bf16.msra.mxu3 %v2944_v63  ;;  %2406 = vmatpush.bf16.msrb.mxu0 %v3196_v0  ;;  %v3925_v63 = vld [vmem:[%s6171_s7 + $0x84] sm:$0xf]  ;;  %v3001_v0 = vld [vmem:[%s6171_s7 + $0x9c] sm:$0xf0] }
 0x213   :  { %2416 = vmatpush.bf16.msrb.mxu1 %v3504_v2  ;;  %2428 = vmatpush.bf16.msrb.mxu2 %v3756_v3  ;;  %v3988_v2 = vld [vmem:[%s6171_s7 + $0x27c] sm:$0xf]  ;;  %v3253_v3 = vld [vmem:[%s6171_s7 + $0x294] sm:$0xf0]  ;;  %v3004_v10 = vor.u32 %v3925_v63, %v3001_v0  ;;  %v3091_v63 = vld [vmem:[%s6171_s7 + $0x130] sm:$0xf] }
 0x214   :  { %v3256_v11 = vor.u32 %v3988_v2, %v3253_v3  ;;  %v3950_v0 = vld [vmem:[%s6171_s7 + $0x148] sm:$0xf0]  ;;  %v4013_v2 = vld [vmem:[%s6171_s7 + $0x340] sm:$0xf0] }
 0x215   :  { %2395 = vmatmul.bf16.vlgmr.msra.gmra.mxu3 %v5151_v28 }
 0x216   :  { %2439 = vmatpush.bf16.msrb.mxu3 %v3144_v7  ;;  %2407 = vmatpush.bf16.msrb.mxu0 %v3168_v15  ;;  %v3813_v7 = vld [vmem:[%s6171_s7 + $0x6f4] sm:$0xf0] }
 0x217   :  { %2417 = vmatpush.bf16.msrb.mxu1 %v3476_v16  ;;  %2429 = vmatpush.bf16.msrb.mxu2 %v3728_v17  ;;  %v3816_v15 = vor.u32 %v4128_v6, %v3813_v7  ;;  %v3981_v16 = vld [vmem:[%s6171_s7 + $0x244] sm:$0xf]  ;;  %v3225_v17 = vld [vmem:[%s6171_s7 + $0x25c] sm:$0xf0]  ;;  %v3421_v6 = vld [vmem:[%s6171_s7 + $0x3e4] sm:$0xf0]  ;;  %v3092_v7 = vor.u32 %v3950_v0, %v3091_v63 }
 0x218   :  { %v3228_v23 = vor.u32 %v3981_v16, %v3225_v17  ;;  %v3424_v16 = vor.u32 %v4030_v5, %v3421_v6  ;;  %v4062_v63 = vld [vmem:[%s6171_s7 + $0x4c8] sm:$0xf0]  ;;  %v3791_v0 = vld [vmem:[%s6171_s7 + $0x6a8] sm:$0xf]  ;;  %v2951_v6 = vld [vmem:[%s6171_s7 + $0x18] sm:$0xf] }
 0x219   :  { %2408 = vmatmul.bf16.vlgmr.msrb.gmra.mxu0 %v5166_v40 }
 0x21a   :  { %2440 = vmatpush.bf16.msrb.mxu3 %v3116_v20  ;;  %2452 = vmatpush.bf16.msra.mxu0 %v3368_v21  ;;  %v4121_v20 = vld [vmem:[%s6171_s7 + $0x6a4] sm:$0xf]  ;;  %v3785_v21 = vld [vmem:[%s6171_s7 + $0x6bc] sm:$0xf0] }
 0x21b   :  { %2418 = vmatpush.bf16.msrb.mxu1 %v3448_v30  ;;  %2430 = vmatpush.bf16.msrb.mxu2 %v3700_v31  ;;  %v3788_v29 = vor.u32 %v4121_v20, %v3785_v21  ;;  %v3974_v30 = vld [vmem:[%s6171_s7 + $0x20c] sm:$0xf]  ;;  %v3197_v31 = vld [vmem:[%s6171_s7 + $0x224] sm:$0xf0]  ;;  %v3064_v20 = vor.u32 %v3943_v13, %v3063_v12  ;;  %v3511_v13 = vld [vmem:[%s6171_s7 + $0x478] sm:$0xf] }
 0x21c   :  { %v3200_v39 = vor.u32 %v3974_v30, %v3197_v31  ;;  %v3999_v30 = vld [vmem:[%s6171_s7 + $0x2d0] sm:$0xf0]  ;;  %v3978_v12 = vld [vmem:[%s6171_s7 + $0x228] sm:$0xf0] }
 0x21e   :  { %2441 = vmatpush.bf16.msrb.mxu3 %v3088_v34  ;;  %2453 = vmatpush.bf16.msra.mxu0 %v3340_v35  ;;  %v4114_v34 = vld [vmem:[%s6171_s7 + $0x66c] sm:$0xf]  ;;  %v3757_v35 = vld [vmem:[%s6171_s7 + $0x684] sm:$0xf0] }
 0x21f   :  { %2419 = vmatpush.bf16.msrb.mxu1 %v3420_v43  ;;  %2431 = vmatpush.bf16.msrb.mxu2 %v3672_v44  ;;  %v3760_v43 = vor.u32 %v4114_v34, %v3757_v35  ;;  %v3169_v44 = vld [vmem:[%s6171_s7 + $0x1ec] sm:$0xf0]  ;;  %v3396_v34 = vor.u32 %v4023_v18, %v3393_v19 }
 0x220   :  { %v3172_v54 = vor.u32 %v3967_v41, %v3169_v44  ;;  %v3007_v41 = vld [vmem:[%s6171_s7 + $0x88] sm:$0xf]  ;;  %v3259_v44 = vld [vmem:[%s6171_s7 + $0x280] sm:$0xf] }
 0x222   :  { %2442 = vmatpush.bf16.msrb.mxu3 %v3060_v47  ;;  %2454 = vmatpush.bf16.msra.mxu0 %v3312_v48  ;;  %v3148_v47 = vor.u32 %v3964_v37, %v3147_v36  ;;  %v4107_v48 = vld [vmem:[%s6171_s7 + $0x634] sm:$0xf] }
 0x223   :  { %2420 = vmatpush.bf16.msrb.mxu1 %v3392_v57  ;;  %2432 = vmatpush.bf16.msrb.mxu2 %v3644_v58  ;;  %v3732_v56 = vor.u32 %v4107_v48, %v3729_v49  ;;  %v4037_v57 = vld [vmem:[%s6171_s7 + $0x404] sm:$0xf]  ;;  %v3449_v58 = vld [vmem:[%s6171_s7 + $0x41c] sm:$0xf0]  ;;  %v4079_v36 = vld [vmem:[%s6171_s7 + $0x554] sm:$0xf] }
 0x224   :  { %v3452_v3 = vor.u32 %v4037_v57, %v3449_v58  ;;  %v3819_v48 = vld [vmem:[%s6171_s7 + $0x6e0] sm:$0xf]  ;;  %v4132_v49 = vld [vmem:[%s6171_s7 + $0x6f8] sm:$0xf0] }
 0x225   :  { %v3820_v58 = vor.u32 %v4132_v49, %v3819_v48  ;;  %v3427_v48 = vld [vmem:[%s6171_s7 + $0x3d0] sm:$0xf] }
 0x226   :  { %2443 = vmatpush.bf16.msrb.mxu3 %v3032_v60  ;;  %2455 = vmatpush.bf16.msra.mxu0 %v3284_v61  ;;  %v3372_v60 = vor.u32 %v4020_v53, %v3371_v52  ;;  %v4100_v61 = vld [vmem:[%s6171_s7 + $0x5fc] sm:$0xf]  ;;  %v3260_v53 = vor.u32 %v3992_v45, %v3259_v44 }
 0x227   :  { %2465 = vmatpush.bf16.msra.mxu1 %v3592_v1  ;;  %2433 = vmatpush.bf16.msrb.mxu2 %v3616_v8  ;;  %v3343_v1 = vld [vmem:[%s6171_s7 + $0x328] sm:$0xf]  ;;  %v3704_v4 = vor.u32 %v4100_v61, %v3701_v62  ;;  %v3539_v61 = vld [vmem:[%s6171_s7 + $0x4b0] sm:$0xf] }
 0x228   :  { %2421 = vmatmul.bf16.vlgmr.msrb.gmra.mxu1 %v5216_v9  ;;  %v3344_v8 = vor.u32 %v4013_v2, %v3343_v1  ;;  %v4125_v1 = vld [vmem:[%s6171_s7 + $0x6c0] sm:$0xf0]  ;;  %v1013_v2 = vperm.slane %v6033_v51, 0 }
 0x22a   :  { %2444 = vmatpush.bf16.msrb.mxu3 %v3004_v10  ;;  %2456 = vmatpush.bf16.msra.mxu0 %v3256_v11  ;;  %v4093_v10 = vld [vmem:[%s6171_s7 + $0x5c4] sm:$0xf]  ;;  %v3673_v11 = vld [vmem:[%s6171_s7 + $0x5dc] sm:$0xf0] }
 0x22b   :  { %2466 = vmatpush.bf16.msra.mxu1 %v3564_v14  ;;  %2478 = vmatpush.bf16.msra.mxu2 %v3816_v15  ;;  %v3315_v14 = vld [vmem:[%s6171_s7 + $0x2f0] sm:$0xf]  ;;  %v4006_v15 = vld [vmem:[%s6171_s7 + $0x308] sm:$0xf0]  ;;  %v3676_v17 = vor.u32 %v4093_v10, %v3673_v11  ;;  %v3792_v10 = vor.u32 %v4125_v1, %v3791_v0 }
 0x22c   :  { %2434 = vmatmul.bf16.vlgmr.msrb.gmra.mxu2 %v5244_v25  ;;  %v3316_v21 = vor.u32 %v4006_v15, %v3315_v14  ;;  %v3203_v11 = vld [vmem:[%s6171_s7 + $0x210] sm:$0xf]  ;;  %v4055_v14 = vld [vmem:[%s6171_s7 + $0x490] sm:$0xf0] }
 0x22d   :  { %v3763_v15 = vld [vmem:[%s6171_s7 + $0x670] sm:$0xf]  ;;  %v3204_v19 = vor.u32 %v3978_v12, %v3203_v11 }
 0x22e   :  { %2445 = vmatpush.bf16.msrb.mxu3 %v2976_v22  ;;  %2457 = vmatpush.bf16.msra.mxu0 %v3228_v23  ;;  %v4086_v23 = vld [vmem:[%s6171_s7 + $0x58c] sm:$0xf] }
 0x22f   :  { %2467 = vmatpush.bf16.msra.mxu1 %v3536_v27  ;;  %2479 = vmatpush.bf16.msra.mxu2 %v3788_v29  ;;  %v3936_v27 = vld [vmem:[%s6171_s7 + $0xd8] sm:$0xf0]  ;;  %v3287_v29 = vld [vmem:[%s6171_s7 + $0x2b8] sm:$0xf]  ;;  %v3648_v35 = vor.u32 %v4086_v23, %v3645_v24 }
 0x230   :  { %v3036_v37 = vor.u32 %v3936_v27, %v3035_v26  ;;  %v3175_v24 = vld [vmem:[%s6171_s7 + $0x1d8] sm:$0xf]  ;;  %v3971_v26 = vld [vmem:[%s6171_s7 + $0x1f0] sm:$0xf0]  ;;  %v3483_v27 = vld [vmem:[%s6171_s7 + $0x440] sm:$0xf] }
 0x232   :  { %2446 = vmatpush.bf16.msrb.mxu3 %v2948_v38  ;;  %2458 = vmatpush.bf16.msra.mxu0 %v3200_v39  ;;  %v3288_v38 = vor.u32 %v3999_v30, %v3287_v29  ;;  %v3617_v39 = vld [vmem:[%s6171_s7 + $0x56c] sm:$0xf0]  ;;  %v4048_v30 = vld [vmem:[%s6171_s7 + $0x458] sm:$0xf0] }
 0x233   :  { %2468 = vmatpush.bf16.msra.mxu1 %v3508_v42  ;;  %2480 = vmatpush.bf16.msra.mxu2 %v3760_v43  ;;  %v3929_v42 = vld [vmem:[%s6171_s7 + $0xa0] sm:$0xf0]  ;;  %v3596_v43 = vor.u32 %v4076_v33, %v3595_v32  ;;  %v3620_v50 = vor.u32 %v4079_v36, %v3617_v39  ;;  %v4111_v32 = vld [vmem:[%s6171_s7 + $0x650] sm:$0xf0]  ;;  %v3455_v39 = vld [vmem:[%s6171_s7 + $0x408] sm:$0xf] }
 0x234   :  { %v3008_v52 = vor.u32 %v3929_v42, %v3007_v41  ;;  %v4041_v42 = vld [vmem:[%s6171_s7 + $0x420] sm:$0xf0] }
 0x235   :  { %2447 = vmatmul.bf16.vlgmr.msrb.gmra.mxu3 %v5151_v28 }
 0x236   :  { %2491 = vmatpush.bf16.msra.mxu3 %v3148_v47  ;;  %2459 = vmatpush.bf16.msra.mxu0 %v3172_v54  ;;  %v5972_v22 = vpop.f32.mrf.mxu0  ;;  %v4069_v47 = vld [vmem:[%s6171_s7 + $0x500] sm:$0xf0] }
 0x237   :  { %2469 = vmatpush.bf16.msra.mxu1 %v3480_v55  ;;  %2481 = vmatpush.bf16.msra.mxu2 %v3732_v56  ;;  %v2979_v55 = vld [vmem:[%s6171_s7 + $0x50] sm:$0xf]  ;;  %v3922_v56 = vld [vmem:[%s6171_s7 + $0x68] sm:$0xf0]  ;;  %v3568_v57 = vor.u32 %v4069_v47, %v3567_v46  ;;  %v3456_v46 = vor.u32 %v4041_v42, %v3455_v39 }
 0x238   :  { %v5992_v31 = vpop.f32.mrf.mxu3 }
 0x239   :  { %2460 = vmatmul.bf16.vlgmr.msra.gmra.mxu0 %v5166_v40 }
 0x23a   :  { %2492 = vmatpush.bf16.msra.mxu3 %v3120_v59  ;;  %2504 = vmatpush.bf16.msrb.mxu0 %v3372_v60  ;;  %v3231_v59 = vld [vmem:[%s6171_s7 + $0x248] sm:$0xf]  ;;  %v3985_v60 = vld [vmem:[%s6171_s7 + $0x260] sm:$0xf0] }
 0x23b   :  { %2470 = vmatpush.bf16.msra.mxu1 %v3452_v3  ;;  %2482 = vmatpush.bf16.msra.mxu2 %v3704_v4  ;;  %v2980_v3 = vor.u32 %v3922_v56, %v2979_v55  ;;  %v3232_v4 = vor.u32 %v3985_v60, %v3231_v59  ;;  %v4027_v59 = vld [vmem:[%s6171_s7 + $0x3b0] sm:$0xf0]  ;;  %v3651_v60 = vld [vmem:[%s6171_s7 + $0x590] sm:$0xf] }
 0x23e   :  { %2493 = vmatpush.bf16.msra.mxu3 %v3092_v7  ;;  %2505 = vmatpush.bf16.msrb.mxu0 %v3344_v8  ;;  %v2203_v54 = vpop.f32.mrf.mxu0  ;;  %v3915_v7 = vld [vmem:[%s6171_s7 + $0x30] sm:$0xf0]  ;;  %v3540_v8 = vor.u32 %v4062_v63, %v3539_v61 }
 0x23f   :  { %2471 = vmatpush.bf16.msra.mxu1 %v3424_v16  ;;  %2483 = vmatpush.bf16.msra.mxu2 %v3676_v17  ;;  %v4118_v16 = vld [vmem:[%s6171_s7 + $0x688] sm:$0xf0]  ;;  %v2189_v17 = vadd.f32 %v5992_v31, %v1013_v2  ;;  %v2952_v18 = vor.u32 %v3915_v7, %v2951_v6  ;;  %v3735_v31 = vld [vmem:[%s6171_s7 + $0x638] sm:$0xf] }
 0x240   :  { %v2190_v62 = vpop.f32.mrf.mxu3  ;;  %v3764_v23 = vor.u32 %v4118_v16, %v3763_v15 }
 0x241   :  { %v2202_v33 = vadd.f32 %v5972_v22, %v2189_v17  ;;  %v3707_v22 = vld [vmem:[%s6171_s7 + $0x600] sm:$0xf] }
 0x242   :  { %2494 = vmatpush.bf16.msra.mxu3 %v3064_v20  ;;  %2506 = vmatpush.bf16.msrb.mxu0 %v3316_v21  ;;  %v2214_v5 = vpop.f32.mrf.mxu1  ;;  %v3512_v21 = vor.u32 %v4055_v14, %v3511_v13  ;;  %v1015_v14 = vperm.slane %v6033_v51, 2 }
 0x243   :  { %2472 = vmatpush.bf16.msra.mxu1 %v3396_v34  ;;  %2484 = vmatpush.bf16.msra.mxu2 %v3648_v35  ;;  %v3176_v34 = vor.u32 %v3971_v26, %v3175_v24  ;;  %v2215_v36 = vadd.f32 %v2214_v5, %v2202_v33 }
 0x246   :  { %2495 = vmatpush.bf16.msra.mxu3 %v3036_v37  ;;  %2507 = vmatpush.bf16.msrb.mxu0 %v3288_v38  ;;  %v6087_v20 = vpop.f32.mrf.mxu0  ;;  %v3484_v37 = vor.u32 %v4048_v30, %v3483_v27  ;;  %v3736_v38 = vor.u32 %v4111_v32, %v3735_v31 }
 0x247   :  { %2517 = vmatpush.bf16.msrb.mxu1 %v3596_v43  ;;  %2485 = vmatpush.bf16.msra.mxu2 %v3620_v50  ;;  %v4104_v43 = vld [vmem:[%s6171_s7 + $0x618] sm:$0xf0]  ;;  %v4034_v50 = vld [vmem:[%s6171_s7 + $0x3e8] sm:$0xf0] }
 0x248   :  { %2473 = vmatmul.bf16.vlgmr.msra.gmra.mxu1 %v5216_v9  ;;  %v2240_v29 = vpop.f32.mrf.mxu3  ;;  %v3708_v47 = vor.u32 %v4104_v43, %v3707_v22  ;;  %v3428_v55 = vor.u32 %v4034_v50, %v3427_v48 }
 0x24a   :  { %2496 = vmatpush.bf16.msra.mxu3 %v3008_v52  ;;  %2508 = vmatpush.bf16.msrb.mxu0 %v3260_v53  ;;  %v2216_v35 = vpop.f32.mrf.mxu1  ;;  %v4097_v52 = vld [vmem:[%s6171_s7 + $0x5e0] sm:$0xf0]  ;;  %v1014_v53 = vperm.slane %v6033_v51, 1 }
 0x24b   :  { %2518 = vmatpush.bf16.msrb.mxu1 %v3568_v57  ;;  %2530 = vmatpush.bf16.msrb.mxu2 %v3820_v58  ;;  %v3399_v57 = vld [vmem:[%s6171_s7 + $0x398] sm:$0xf] }
 0x24c   :  { %2486 = vmatmul.bf16.vlgmr.msra.gmra.mxu2 %v5244_v25  ;;  %v2227_v41 = vpop.f32.mrf.mxu2  ;;  %v2241_v62 = vadd.f32 %v2240_v29, %v1014_v53  ;;  %v3400_v0 = vor.u32 %v4027_v59, %v3399_v57  ;;  %v1018_v59 = vperm.slane %v6033_v51, 5 }
 0x24d   :  { %v2228_v44 = vadd.f32 %v2227_v41, %v2215_v36 }
 0x24e   :  { %2497 = vmatpush.bf16.msra.mxu3 %v2980_v3  ;;  %2509 = vmatpush.bf16.msrb.mxu0 %v3232_v4  ;;  %v2255_v45 = vpop.f32.mrf.mxu0  ;;  %v3623_v3 = vld [vmem:[%s6171_s7 + $0x558] sm:$0xf]  ;;  %v4083_v4 = vld [vmem:[%s6171_s7 + $0x570] sm:$0xf0]  ;;  %v2254_v5 = vadd.f32 %v6087_v20, %v2241_v62 }
 0x24f   :  { %2519 = vmatpush.bf16.msrb.mxu1 %v3540_v8  ;;  %2531 = vmatpush.bf16.msrb.mxu2 %v3792_v10  ;;  %4135 = vtanh.f32 %v2228_v44  ;;  %v3624_v8 = vor.u32 %v4083_v4, %v3623_v3  ;;  %v1017_v45 = vperm.slane %v6033_v51, 4 }
 0x250   :  { %v2242_v49 = vpop.f32.mrf.mxu3 }
 0x252   :  { %2498 = vmatpush.bf16.msra.mxu3 %v2952_v18  ;;  %2510 = vmatpush.bf16.msrb.mxu0 %v3204_v19  ;;  %v2266_v54 = vpop.f32.mrf.mxu1 }
 0x253   :  { %2520 = vmatpush.bf16.msrb.mxu1 %v3512_v21  ;;  %2532 = vmatpush.bf16.msrb.mxu2 %v3764_v23  ;;  %v2267_v7 = vadd.f32 %v2266_v54, %v2254_v5 }
 0x254   :  { %v2229_v58 = vpop.f32.mrf.mxu2 }
 0x255   :  { %2499 = vmatmul.bf16.vlgmr.msra.gmra.mxu3 %v5151_v28  ;;  %v3679_v28 = vld [vmem:[%s6171_s7 + $0x5c8] sm:$0xf]  ;;  %v4136_v61 = vpop.eup %4135 }
 0x256   :  { %2511 = vmatpush.bf16.msrb.mxu0 %v3176_v34  ;;  %v3680_v56 = vor.u32 %v4097_v52, %v3679_v28  ;;  %2550 = vst [vmem:[#allocation2] sm:$0xff] %v4136_v61  ;;  %v2305_v63 = vpop.f32.mrf.mxu0 }
 0x257   :  { %2521 = vmatpush.bf16.msrb.mxu1 %v3484_v37  ;;  %2533 = vmatpush.bf16.msrb.mxu2 %v3736_v38 }
 0x258   :  { %v2292_v2 = vpop.f32.mrf.mxu3 }
 0x259   :  { %2512 = vmatmul.bf16.vlgmr.msrb.gmra.mxu0 %v5166_v40  ;;  %v4090_v40 = vld [vmem:[%s6171_s7 + $0x5a8] sm:$0xf0]  ;;  %v2293_v18 = vadd.f32 %v2292_v2, %v1015_v14  ;;  %s4175_s7 = smov [#allocation2]  }
 0x25a   :  { %v3652_v1 = vor.u32 %v4090_v40, %v3651_v60  ;;  %v2268_v6 = vpop.f32.mrf.mxu1  ;;  %s2562_s23 = sshll.u32 %s4175_s7, 4  ;;  %s2563_s23 = int_to_ptr.vmem [resolvable:$true] %s2562_s23 }
 0x25b   :  { %2522 = vmatpush.bf16.msrb.mxu1 %v3456_v46  ;;  %2534 = vmatpush.bf16.msrb.mxu2 %v3708_v47  ;;  %v2306_v19 = vadd.f32 %v2305_v63, %v2293_v18 }
 0x25c   :  { %v2279_v10 = vpop.f32.mrf.mxu2 }
 0x25d   :  { %v2280_v11 = vadd.f32 %v2279_v10, %v2267_v7 }
 0x25e   :  { %v2307_v12 = vpop.f32.mrf.mxu0 }
 0x25f   :  { %2523 = vmatpush.bf16.msrb.mxu1 %v3428_v55  ;;  %2535 = vmatpush.bf16.msrb.mxu2 %v3680_v56  ;;  %4137 = vtanh.f32 %v2280_v11 }
 0x260   :  { %v2294_v13 = vpop.f32.mrf.mxu3 }
 0x263   :  { %2524 = vmatpush.bf16.msrb.mxu1 %v3400_v0  ;;  %2536 = vmatpush.bf16.msrb.mxu2 %v3652_v1 }
 0x264   :  { %v2281_v16 = vpop.f32.mrf.mxu2 }
 0x265   :  { %v2318_v15 = vpop.f32.mrf.mxu1  ;;  %v4138_v17 = vpop.eup %4137 }
 0x266   :  { %2525 = vmatmul.bf16.vlgmr.msrb.gmra.mxu1 %v5216_v9  ;;  %2551 = vst [vmem:[#allocation2 + $0x8] sm:$0xff] %v4138_v17  ;;  %v2319_v21 = vadd.f32 %v2318_v15, %v2306_v19 }
 0x267   :  { %2537 = vmatpush.bf16.msrb.mxu2 %v3624_v8  ;;  %v1019_v8 = vperm.slane %v6033_v51, 6 }
 0x26a   :  { %2538 = vmatmul.bf16.vlgmr.msrb.gmra.mxu2 %v5244_v25  ;;  %v1016_v25 = vperm.slane %v6033_v51, 3 }
 0x26d   :  { %v2320_v20 = vpop.f32.mrf.mxu1 }
 0x26f   :  { %v2331_v23 = vpop.f32.mrf.mxu2 }
 0x270   :  { %v2332_v24 = vadd.f32 %v2331_v23, %v2319_v21 }
 0x272   :  { %4139 = vtanh.f32 %v2332_v24 }
 0x276   :  { %v2357_v9 = vpop.f32.mrf.mxu0 }
 0x277   :  { %v2333_v26 = vpop.f32.mrf.mxu2 }
 0x278   :  { %v4140_v27 = vpop.eup %4139  ;;  %v2344_v29 = vpop.f32.mrf.mxu3 }
 0x279   :  { %2552 = vst [vmem:[#allocation2 + $0x10] sm:$0xff] %v4140_v27  ;;  %v2345_v33 = vadd.f32 %v2344_v29, %v1016_v25 }
 0x27b   :  { %v2358_v34 = vadd.f32 %v2357_v9, %v2345_v33 }
 0x27e   :  { %v2359_v30 = vpop.f32.mrf.mxu0 }
 0x280   :  { %v2346_v31 = vpop.f32.mrf.mxu3 }
 0x285   :  { %v2370_v32 = vpop.f32.mrf.mxu1 }
 0x286   :  { %v2371_v36 = vadd.f32 %v2370_v32, %v2358_v34 }
 0x28d   :  { %v2372_v35 = vpop.f32.mrf.mxu1 }
 0x28f   :  { %v2383_v37 = vpop.f32.mrf.mxu2 }
 0x290   :  { %v2384_v38 = vadd.f32 %v2383_v37, %v2371_v36 }
 0x292   :  { %4141 = vtanh.f32 %v2384_v38 }
 0x296   :  { %v2409_v39 = vpop.f32.mrf.mxu0 }
 0x297   :  { %v2385_v41 = vpop.f32.mrf.mxu2 }
 0x298   :  { %v4142_v42 = vpop.eup %4141  ;;  %v2396_v22 = vpop.f32.mrf.mxu3 }
 0x299   :  { %2553 = vst [vmem:[#allocation2 + $0x18] sm:$0xff] %v4142_v42  ;;  %v2397_v47 = vadd.f32 %v2396_v22, %v1017_v45 }
 0x29b   :  { %v2410_v48 = vadd.f32 %v2409_v39, %v2397_v47 }
 0x29e   :  { %v2411_v43 = vpop.f32.mrf.mxu0 }
 0x2a0   :  { %v2398_v44 = vpop.f32.mrf.mxu3 }
 0x2a5   :  { %v2422_v46 = vpop.f32.mrf.mxu1 }
 0x2a6   :  { %v2423_v50 = vadd.f32 %v2422_v46, %v2410_v48 }
 0x2ad   :  { %v2424_v49 = vpop.f32.mrf.mxu1 }
 0x2af   :  { %v2435_v28 = vpop.f32.mrf.mxu2 }
 0x2b0   :  { %v2436_v52 = vadd.f32 %v2435_v28, %v2423_v50 }
 0x2b2   :  { %4143 = vtanh.f32 %v2436_v52 }
 0x2b6   :  { %v2461_v53 = vpop.f32.mrf.mxu0 }
 0x2b7   :  { %v2437_v54 = vpop.f32.mrf.mxu2 }
 0x2b8   :  { %v4144_v55 = vpop.eup %4143  ;;  %v2448_v56 = vpop.f32.mrf.mxu3 }
 0x2b9   :  { %2554 = vst [vmem:[#allocation2 + $0x20] sm:$0xff] %v4144_v55  ;;  %v2449_v40 = vadd.f32 %v2448_v56, %v1018_v59 }
 0x2bb   :  { %v2462_v61 = vadd.f32 %v2461_v53, %v2449_v40 }
 0x2be   :  { %v2463_v57 = vpop.f32.mrf.mxu0 }
 0x2c0   :  { %v2450_v58 = vpop.f32.mrf.mxu3 }
 0x2c5   :  { %v2474_v60 = vpop.f32.mrf.mxu1 }
 0x2c6   :  { %v2475_v63 = vadd.f32 %v2474_v60, %v2462_v61 }
 0x2cd   :  { %v2476_v62 = vpop.f32.mrf.mxu1 }
 0x2cf   :  { %v2487_v0 = vpop.f32.mrf.mxu2 }
 0x2d0   :  { %v2488_v1 = vadd.f32 %v2487_v0, %v2475_v63 }
 0x2d2   :  { %4145 = vtanh.f32 %v2488_v1 }
 0x2d6   :  { %v2513_v2 = vpop.f32.mrf.mxu0 }
 0x2d7   :  { %v2489_v3 = vpop.f32.mrf.mxu2 }
 0x2d8   :  { %v4146_v4 = vpop.eup %4145  ;;  %v2500_v5 = vpop.f32.mrf.mxu3 }
 0x2d9   :  { %2555 = vst [vmem:[#allocation2 + $0x28] sm:$0xff] %v4146_v4  ;;  %v2501_v11 = vadd.f32 %v2500_v5, %v1019_v8 }
 0x2db   :  { %v2514_v12 = vadd.f32 %v2513_v2, %v2501_v11 }
 0x2de   :  { %v2515_v6 = vpop.f32.mrf.mxu0 }
 0x2e0   :  { %v2502_v7 = vpop.f32.mrf.mxu3 }
 0x2e3   :  { %v2526_v10 = vpop.f32.mrf.mxu1 }
 0x2e4   :  { %v2527_v14 = vadd.f32 %v2526_v10, %v2514_v12 }
 0x2eb   :  { %v2528_v13 = vpop.f32.mrf.mxu1 }
 0x2ed   :  { %v2539_v15 = vpop.f32.mrf.mxu2 }
 0x2ee   :  { %v2540_v16 = vadd.f32 %v2539_v15, %v2527_v14 }
 0x2f0   :  { %4147 = vtanh.f32 %v2540_v16 }
 0x2f5   :  { %v2541_v17 = vpop.f32.mrf.mxu2 }
 0x2f6   :  { %v4148_v18 = vpop.eup %4147 }
 0x2f7   :  { %2556 = vst [vmem:[#allocation2 + $0x30] sm:$0xff] %v4148_v18 }
 0x2f8   :  { %2567 = dma.vmem_to_hbm [thread:$0]  %s2563_s23, 896, %s2565_s26, [#allocation3]  }
 0x2f9   :  { %4173 = dma.done.wait [#allocation3], 896  }
 0x2fa   :  { %4174 = vsyncadd [#allocation3], 4294966400 }
 0x2fb   :  { %2572 = vsyncpa [#allocation3], 1 }

</bundles_post_ra>
